<compile_context>
chip_gen: v7x
topology: tpu7x:2x2x1
jax: 0.10.0
libtpu: 0.0.40
codegen_flags: <defaults>
</compile_context>

<pallas_src>
import functools
import math

import jax
import jax.numpy as jnp
from jax import lax
from jax.experimental import pallas as pl
from jax.experimental.pallas import tpu as pltpu


# ----------------------------------------------------------------------------
# In-kernel helpers
# ----------------------------------------------------------------------------

def _scatter_banded(a_scr, v, *, H, W, C, row_pad):
    """Scatter activation v:(H, W*C) into the banded im2col scratch a_scr:(H, 3*row_pad).

    Lane block kh (lanes [kh*row_pad, (kh+1)*row_pad)) of row h holds the
    zero-padded image row h+kh, channel-collapsed as (W+2)*C values (plus zero
    lanes up to row_pad).  Only the interior is written; the zero halo comes
    from the initial zero fill of a_scr (and is never overwritten, so the
    scratch can be reused for a second conv without re-zeroing).
    """
    lo = C                 # lane offset of image column 0 inside a row block
    hi = (W + 1) * C       # one past image column W-1
    # kh = 0 : a[h] = xpad[h]   -> rows 1..H-1 get v rows 0..H-2
    a_scr[1:H, 0 * row_pad + lo:0 * row_pad + hi] = v[0:H - 1]
    # kh = 1 : a[h] = xpad[h+1] -> all rows get v
    a_scr[0:H, 1 * row_pad + lo:1 * row_pad + hi] = v
    # kh = 2 : a[h] = xpad[h+2] -> rows 0..H-2 get v rows 1..H-1
    a_scr[0:H - 1, 2 * row_pad + lo:2 * row_pad + hi] = v[1:H]


def _banded_conv(a_scr, w_ref, b_ref):
    """One MXU matmul: bf16 (H, 3*row_pad) @ bf16 (3*row_pad, W*Cout) -> f32 + bias."""
    a = a_scr[...].astype(jnp.bfloat16)
    y = jnp.dot(a, w_ref[...], preferred_element_type=jnp.float32)
    return y + b_ref[...]


# ----------------------------------------------------------------------------
# Pallas kernels
# ----------------------------------------------------------------------------

def _firstconv_pool_kernel(x_ref, w_ref, b_ref, o_ref, a_scr, wp_scr, *,
                           H, W, Cin, Cout, row_pad):
    """Fused: 3x3 'same' conv (+bias) then max_pool2d(k=3, s=2, p=1).

    x_ref : (1, H, W*Cin)        f32  channel-collapsed NHWC
    w_ref : (3*row_pad, W*Cout)  bf16 banded (block-Toeplitz) conv weights
    b_ref : (1, W*Cout)          f32  bias tiled along W
    o_ref : (1, Ho, Wo*Cout)     f32
    a_scr : (H, 3*row_pad)       f32  banded im2col scratch
    wp_scr: (H, Wo*Cout)         f32  width-pooled intermediate
    """
    Ho, Wo = (H + 1) // 2, (W + 1) // 2

    a_scr[...] = jnp.zeros_like(a_scr)
    _scatter_banded(a_scr, x_ref[0], H=H, W=W, C=Cin, row_pad=row_pad)
    y = _banded_conv(a_scr, w_ref, b_ref)                  # (H, W*Cout) f32

    # width direction of max_pool2d(3,2,1): window w in {2j-1, 2j, 2j+1}
    for j in range(Wo):
        lo = max(2 * j - 1, 0)
        hi = min(2 * j + 1, W - 1)
        blk = y[:, lo * Cout:(lo + 1) * Cout]
        for w in range(lo + 1, hi + 1):
            blk = jnp.maximum(blk, y[:, w * Cout:(w + 1) * Cout])
        wp_scr[:, j * Cout:(j + 1) * Cout] = blk

    # height direction: window h in {2i-1, 2i, 2i+1}
    wm = wp_scr[...]
    for i in range(Ho):
        lo = max(2 * i - 1, 0)
        hi = min(2 * i + 1, H - 1)
        row = wm[lo:lo + 1, :]
        for h in range(lo + 1, hi + 1):
            row = jnp.maximum(row, wm[h:h + 1, :])
        o_ref[0, i:i + 1, :] = row.astype(o_ref.dtype)


def _res_block_kernel(x_ref, w0_ref, b0_ref, w1_ref, b1_ref, o_ref, a_scr, *,
                      H, W, C, row_pad):
    """Fused Impala residual block: out = x + conv1(relu(conv0(relu(x))))."""
    x = x_ref[0]                                           # (H, W*C) f32

    a_scr[...] = jnp.zeros_like(a_scr)
    _scatter_banded(a_scr, jnp.maximum(x, 0.0), H=H, W=W, C=C, row_pad=row_pad)
    r = _banded_conv(a_scr, w0_ref, b0_ref)                # conv0 output, f32

    # Interior is fully overwritten; zero halo untouched -> no re-zero needed.
    _scatter_banded(a_scr, jnp.maximum(r, 0.0), H=H, W=W, C=C, row_pad=row_pad)
    y = _banded_conv(a_scr, w1_ref, b1_ref)                # conv1 output, f32

    o_ref[0] = (x + y).astype(o_ref.dtype)                 # residual add in f32


# ----------------------------------------------------------------------------
# Wrappers (weight packing + pallas_call plumbing)
# ----------------------------------------------------------------------------

def _row_pad(W, Cin):
    return ((W + 2) * Cin + 127) // 128 * 128


def pack_conv3x3(w_oihw, b, W):
    """Pack a (Cout,Cin,3,3) conv into the banded matmul weight used in-kernel.

    big[kh*row_pad + j*Cin + c, w*Cout + o] = w[o, c, kh, j-w] if 0 <= j-w <= 2
    (zero otherwise, including the lane-padding rows).  Returns
    (big: (3*row_pad, W*Cout) bf16, bias: (1, W*Cout) f32).
    """
    Cout, Cin, KH, KW = w_oihw.shape
    assert KH == 3 and KW == 3
    Wp = W + 2
    row_pad = _row_pad(W, Cin)

    wt = jnp.transpose(w_oihw, (2, 3, 1, 0))                  # (3, 3, Cin, Cout)
    kwm = jnp.arange(Wp)[:, None] - jnp.arange(W)[None, :]    # j - w, (Wp, W)
    valid = (kwm >= 0) & (kwm <= 2)
    g = wt[:, jnp.clip(kwm, 0, 2)]                            # (3, Wp, W, Cin, Cout)
    g = jnp.where(valid[None, :, :, None, None], g, 0.0)
    g = jnp.transpose(g, (0, 1, 3, 2, 4)).reshape(3, Wp * Cin, W * Cout)
    g = jnp.pad(g, ((0, 0), (0, row_pad - Wp * Cin), (0, 0)))
    big = g.reshape(3 * row_pad, W * Cout).astype(jnp.bfloat16)
    bias = jnp.tile(b.astype(jnp.float32), W).reshape(1, W * Cout)
    return big, bias


def _compiler_params():
    return pltpu.CompilerParams(
        dimension_semantics=("parallel",),
        vmem_limit_bytes=8 * 1024 * 1024)


def firstconv_maxpool(x, big_w, bias, *, H, W, Cin, Cout):
    """x: (N, H, W*Cin) f32 -> conv3x3 'same' + max_pool(3,2,1) -> (N, Ho, Wo*Cout)."""
    N = x.shape[0]
    Ho, Wo = (H + 1) // 2, (W + 1) // 2
    row_pad = _row_pad(W, Cin)
    kernel = functools.partial(_firstconv_pool_kernel, H=H, W=W, Cin=Cin,
                               Cout=Cout, row_pad=row_pad)
    return pl.pallas_call(
        kernel,
        out_shape=jax.ShapeDtypeStruct((N, Ho, Wo * Cout), jnp.float32),
        grid=(N,),
        in_specs=[
            pl.BlockSpec((1, H, W * Cin), lambda n: (n, 0, 0)),
            pl.BlockSpec((3 * row_pad, W * Cout), lambda n: (0, 0)),
            pl.BlockSpec((1, W * Cout), lambda n: (0, 0)),
        ],
        out_specs=pl.BlockSpec((1, Ho, Wo * Cout), lambda n: (n, 0, 0)),
        scratch_shapes=[
            pltpu.VMEM((H, 3 * row_pad), jnp.float32),
            pltpu.VMEM((H, Wo * Cout), jnp.float32),
        ],
        compiler_params=_compiler_params(),
    )(x, big_w, bias)


def residual_block(x, w0, b0, w1, b1, *, H, W, C):
    """One fused Impala residual block on (N, H, W*C) activations."""
    N = x.shape[0]
    row_pad = _row_pad(W, C)
    kernel = functools.partial(_res_block_kernel, H=H, W=W, C=C, row_pad=row_pad)
    return pl.pallas_call(
        kernel,
        out_shape=jax.ShapeDtypeStruct((N, H, W * C), jnp.float32),
        grid=(N,),
        in_specs=[
            pl.BlockSpec((1, H, W * C), lambda n: (n, 0, 0)),
            pl.BlockSpec((3 * row_pad, W * C), lambda n: (0, 0)),
            pl.BlockSpec((1, W * C), lambda n: (0, 0)),
            pl.BlockSpec((3 * row_pad, W * C), lambda n: (0, 0)),
            pl.BlockSpec((1, W * C), lambda n: (0, 0)),
        ],
        out_specs=pl.BlockSpec((1, H, W * C), lambda n: (n, 0, 0)),
        scratch_shapes=[pltpu.VMEM((H, 3 * row_pad), jnp.float32)],
        compiler_params=_compiler_params(),
    )(x, w0, b0, w1, b1)


# ----------------------------------------------------------------------------
# Parameters (deterministic synthetic init replicating NormedConv2d)
# ----------------------------------------------------------------------------

def normed_conv_params(key, cin, cout, scale=1.0):
    w = jax.random.normal(key, (cout, cin, 3, 3), jnp.float32)
    norm = jnp.sqrt(jnp.sum(w * w, axis=(1, 2, 3), keepdims=True))
    w = w * (scale / norm)
    b = jnp.zeros((cout,), jnp.float32)  # NormedConv2d zeroes the bias
    return w, b


def init_cnn_down_stack(key, inchan, nblock, outchan, scale=1.0):
    keys = jax.random.split(key, 1 + 2 * nblock)
    firstconv = normed_conv_params(keys[0], inchan, outchan, scale=1.0)
    s = math.sqrt(scale / math.sqrt(nblock))
    blocks = []
    for i in range(nblock):
        w0 = normed_conv_params(keys[1 + 2 * i], outchan, outchan, scale=s)
        w1 = normed_conv_params(keys[2 + 2 * i], outchan, outchan, scale=s)
        blocks.append((w0, w1))
    return {"firstconv": firstconv, "blocks": blocks}


# ----------------------------------------------------------------------------
# Forward pass (CnnDownStack.forward, batch_norm=False, pool=True)
# ----------------------------------------------------------------------------

def cnn_down_stack_forward(params, x_nchw):
    N, Cin, H, W = x_nchw.shape
    w, b = params["firstconv"]
    Cout = w.shape[0]
    Ho, Wo = (H + 1) // 2, (W + 1) // 2

    # Pack weights into banded-matmul form (trace-time glue, folded under jit).
    fw, fb = pack_conv3x3(w, b, W)
    packed_blocks = [pack_conv3x3(w0, b0, Wo) + pack_conv3x3(w1, b1, Wo)
                     for (w0, b0), (w1, b1) in params["blocks"]]

    # NCHW -> channel-collapsed NHWC (N, H, W*Cin): lane axis = W*C (dense).
    x = jnp.transpose(x_nchw, (0, 2, 3, 1)).reshape(N, H, W * Cin)

    x = firstconv_maxpool(x, fw, fb, H=H, W=W, Cin=Cin, Cout=Cout)
    for (w0, b0, w1, b1) in packed_blocks:
        x = residual_block(x, w0, b0, w1, b1, H=Ho, W=Wo, C=Cout)

    return jnp.transpose(x.reshape(N, Ho, Wo, Cout), (0, 3, 1, 2))  # -> NCHW


# ----------------------------------------------------------------------------
# Pure-JAX reference (same bf16-operand / f32-accumulate precision as kernel)
# ----------------------------------------------------------------------------

def _ref_conv_bf16(x_nchw, w, b):
    y = lax.conv_general_dilated(
        x_nchw.astype(jnp.bfloat16), w.astype(jnp.bfloat16),
        window_strides=(1, 1), padding=((1, 1), (1, 1)),
        dimension_numbers=("NCHW", "OIHW", "NCHW"),
        preferred_element_type=jnp.float32)
    return y + b[None, :, None, None]


def ref_forward(params, x):
    w, b = params["firstconv"]
    x = _ref_conv_bf16(x, w, b)
    x = lax.reduce_window(x, -jnp.inf, lax.max, (1, 1, 3, 3), (1, 1, 2, 2),
                          ((0, 0), (0, 0), (1, 1), (1, 1)))
    for (w0, b0), (w1, b1) in params["blocks"]:
        r = _ref_conv_bf16(jnp.maximum(x, 0.0), w0, b0)
        r = _ref_conv_bf16(jnp.maximum(r, 0.0), w1, b1)
        x = x + r
    return x


# ----------------------------------------------------------------------------

if __name__ == "__main__":
    key = jax.random.PRNGKey(0)
    k_param, k_x = jax.random.split(key)

    inchan, nblock, outchan = 4, 2, 8
    N, H, W = 2, 16, 16

    params = init_cnn_down_stack(k_param, inchan, nblock, outchan, scale=1.0)
    x = jax.random.normal(k_x, (N, inchan, H, W), jnp.float32)

    out = jax.block_until_ready(jax.jit(cnn_down_stack_forward)(params, x))
    assert out.shape == (N, outchan, (H + 1) // 2, (W + 1) // 2), out.shape

    ref = jax.block_until_ready(ref_forward(params, x))
    max_err = float(jnp.max(jnp.abs(out - ref)))
    assert jnp.allclose(out, ref, atol=1e-2, rtol=1e-2), max_err

    print("KERNEL_OK")
</pallas_src>

<mosaic_0001>
module attributes {stable_mosaic.version = 11 : i64} {
  func.func @_firstconv_pool_kernel(%arg0: i32, %arg1: memref<1x16x64xf32, #tpu.memory_space<vmem>>, %arg2: memref<384x128xbf16, #tpu.memory_space<vmem>>, %arg3: memref<1x128xf32, #tpu.memory_space<vmem>>, %arg4: memref<1x8x64xf32, #tpu.memory_space<vmem>>, %arg5: memref<16x384xf32, #tpu.memory_space<vmem>>, %arg6: memref<16x64xf32, #tpu.memory_space<vmem>>) attributes {dimension_semantics = [#tpu.dimension_semantics<parallel>], iteration_bounds = array<i64: 2>, scalar_prefetch = 0 : i64, scratch_operands = 2 : i64, tpu.core_type = #tpu.core_type<tc>, window_params = [{transform_indices = @transform_0, window_bounds = array<i64: 1, 16, 64>}, {pipeline_mode = #tpu.pipeline_mode<synchronous>, transform_indices = @transform_1, window_bounds = array<i64: 384, 128>}, {pipeline_mode = #tpu.pipeline_mode<synchronous>, transform_indices = @transform_2, window_bounds = array<i64: 1, 128>}, {transform_indices = @transform_3, window_bounds = array<i64: 1, 8, 64>}]} {
    %cst = arith.constant 0.000000e+00 : f32
    %0 = vector.broadcast %cst : f32 to vector<16x384xf32>
    %c0 = arith.constant 0 : index
    %c0_0 = arith.constant 0 : index
    %1 = vector.load %arg5[%c0, %c0_0] : memref<16x384xf32, #tpu.memory_space<vmem>>, vector<16x384xf32>
    tpu.vector_store %arg5[%c0, %c0_0], %0 {strides = array<i32>} : memref<16x384xf32, #tpu.memory_space<vmem>>, vector<16x384xf32>,
    %c0_1 = arith.constant 0 : index
    %c0_2 = arith.constant 0 : index
    %c0_3 = arith.constant 0 : index
    %2 = vector.load %arg1[%c0_1, %c0_2, %c0_3] : memref<1x16x64xf32, #tpu.memory_space<vmem>>, vector<1x16x64xf32>
    %3 = vector.shape_cast %2 : vector<1x16x64xf32> to vector<16x64xf32>
    %4 = vector.extract_strided_slice %3 {offsets = [0, 0], sizes = [15, 64], strides = [1, 1]} : vector<16x64xf32> to vector<15x64xf32>
    %c1 = arith.constant 1 : index
    %c4 = arith.constant 4 : index
    %5 = vector.load %arg5[%c1, %c4] : memref<16x384xf32, #tpu.memory_space<vmem>>, vector<15x64xf32>
    tpu.vector_store %arg5[%c1, %c4], %4 {strides = array<i32>} : memref<16x384xf32, #tpu.memory_space<vmem>>, vector<15x64xf32>,
    %c0_4 = arith.constant 0 : index
    %c132 = arith.constant 132 : index
    %6 = vector.load %arg5[%c0_4, %c132] : memref<16x384xf32, #tpu.memory_space<vmem>>, vector<16x64xf32>
    tpu.vector_store %arg5[%c0_4, %c132], %3 {strides = array<i32>} : memref<16x384xf32, #tpu.memory_space<vmem>>, vector<16x64xf32>,
    %7 = vector.extract_strided_slice %3 {offsets = [1, 0], sizes = [15, 64], strides = [1, 1]} : vector<16x64xf32> to vector<15x64xf32>
    %c0_5 = arith.constant 0 : index
    %c260 = arith.constant 260 : index
    %8 = vector.load %arg5[%c0_5, %c260] : memref<16x384xf32, #tpu.memory_space<vmem>>, vector<15x64xf32>
    tpu.vector_store %arg5[%c0_5, %c260], %7 {strides = array<i32>} : memref<16x384xf32, #tpu.memory_space<vmem>>, vector<15x64xf32>,
    %c0_6 = arith.constant 0 : index
    %c0_7 = arith.constant 0 : index
    %9 = vector.load %arg5[%c0_6, %c0_7] : memref<16x384xf32, #tpu.memory_space<vmem>>, vector<16x384xf32>
    %10 = arith.truncf %9 : vector<16x384xf32> to vector<16x384xbf16>
    %c0_8 = arith.constant 0 : index
    %c0_9 = arith.constant 0 : index
    %11 = vector.load %arg2[%c0_8, %c0_9] : memref<384x128xbf16, #tpu.memory_space<vmem>>, vector<384x128xbf16>
    %cst_10 = arith.constant dense<0.000000e+00> : vector<16x128xf32>
    %12 = tpu.matmul %10, %11, %cst_10 {dimension_numbers = #tpu.dot_dimension_numbers<[1], [0], [0], [1], [0, 0, 1, 1], [], []>} : vector<16x384xbf16>, vector<384x128xbf16>, vector<16x128xf32> -> vector<16x128xf32>
    %c0_11 = arith.constant 0 : index
    %c0_12 = arith.constant 0 : index
    %13 = vector.load %arg3[%c0_11, %c0_12] : memref<1x128xf32, #tpu.memory_space<vmem>>, vector<1x128xf32>
    %14 = vector.broadcast %13 : vector<1x128xf32> to vector<16x128xf32>
    %15 = arith.addf %12, %14 : vector<16x128xf32>
    %16 = vector.extract_strided_slice %15 {offsets = [0, 0], sizes = [16, 8], strides = [1, 1]} : vector<16x128xf32> to vector<16x8xf32>
    %17 = vector.extract_strided_slice %15 {offsets = [0, 8], sizes = [16, 8], strides = [1, 1]} : vector<16x128xf32> to vector<16x8xf32>
    %18 = arith.maximumf %16, %17 : vector<16x8xf32>
    %c0_13 = arith.constant 0 : index
    %c0_14 = arith.constant 0 : index
    %19 = vector.load %arg6[%c0_13, %c0_14] : memref<16x64xf32, #tpu.memory_space<vmem>>, vector<16x8xf32>
    tpu.vector_store %arg6[%c0_13, %c0_14], %18 {strides = array<i32>} : memref<16x64xf32, #tpu.memory_space<vmem>>, vector<16x8xf32>,
    %20 = vector.extract_strided_slice %15 {offsets = [0, 8], sizes = [16, 8], strides = [1, 1]} : vector<16x128xf32> to vector<16x8xf32>
    %21 = vector.extract_strided_slice %15 {offsets = [0, 16], sizes = [16, 8], strides = [1, 1]} : vector<16x128xf32> to vector<16x8xf32>
    %22 = arith.maximumf %20, %21 : vector<16x8xf32>
    %23 = vector.extract_strided_slice %15 {offsets = [0, 24], sizes = [16, 8], strides = [1, 1]} : vector<16x128xf32> to vector<16x8xf32>
    %24 = arith.maximumf %22, %23 : vector<16x8xf32>
    %c0_15 = arith.constant 0 : index
    %c8 = arith.constant 8 : index
    %25 = vector.load %arg6[%c0_15, %c8] : memref<16x64xf32, #tpu.memory_space<vmem>>, vector<16x8xf32>
    tpu.vector_store %arg6[%c0_15, %c8], %24 {strides = array<i32>} : memref<16x64xf32, #tpu.memory_space<vmem>>, vector<16x8xf32>,
    %26 = vector.extract_strided_slice %15 {offsets = [0, 24], sizes = [16, 8], strides = [1, 1]} : vector<16x128xf32> to vector<16x8xf32>
    %27 = vector.extract_strided_slice %15 {offsets = [0, 32], sizes = [16, 8], strides = [1, 1]} : vector<16x128xf32> to vector<16x8xf32>
    %28 = arith.maximumf %26, %27 : vector<16x8xf32>
    %29 = vector.extract_strided_slice %15 {offsets = [0, 40], sizes = [16, 8], strides = [1, 1]} : vector<16x128xf32> to vector<16x8xf32>
    %30 = arith.maximumf %28, %29 : vector<16x8xf32>
    %c0_16 = arith.constant 0 : index
    %c16 = arith.constant 16 : index
    %31 = vector.load %arg6[%c0_16, %c16] : memref<16x64xf32, #tpu.memory_space<vmem>>, vector<16x8xf32>
    tpu.vector_store %arg6[%c0_16, %c16], %30 {strides = array<i32>} : memref<16x64xf32, #tpu.memory_space<vmem>>, vector<16x8xf32>,
    %32 = vector.extract_strided_slice %15 {offsets = [0, 40], sizes = [16, 8], strides = [1, 1]} : vector<16x128xf32> to vector<16x8xf32>
    %33 = vector.extract_strided_slice %15 {offsets = [0, 48], sizes = [16, 8], strides = [1, 1]} : vector<16x128xf32> to vector<16x8xf32>
    %34 = arith.maximumf %32, %33 : vector<16x8xf32>
    %35 = vector.extract_strided_slice %15 {offsets = [0, 56], sizes = [16, 8], strides = [1, 1]} : vector<16x128xf32> to vector<16x8xf32>
    %36 = arith.maximumf %34, %35 : vector<16x8xf32>
    %c0_17 = arith.constant 0 : index
    %c24 = arith.constant 24 : index
    %37 = vector.load %arg6[%c0_17, %c24] : memref<16x64xf32, #tpu.memory_space<vmem>>, vector<16x8xf32>
    tpu.vector_store %arg6[%c0_17, %c24], %36 {strides = array<i32>} : memref<16x64xf32, #tpu.memory_space<vmem>>, vector<16x8xf32>,
    %38 = vector.extract_strided_slice %15 {offsets = [0, 56], sizes = [16, 8], strides = [1, 1]} : vector<16x128xf32> to vector<16x8xf32>
    %39 = vector.extract_strided_slice %15 {offsets = [0, 64], sizes = [16, 8], strides = [1, 1]} : vector<16x128xf32> to vector<16x8xf32>
    %40 = arith.maximumf %38, %39 : vector<16x8xf32>
    %41 = vector.extract_strided_slice %15 {offsets = [0, 72], sizes = [16, 8], strides = [1, 1]} : vector<16x128xf32> to vector<16x8xf32>
    %42 = arith.maximumf %40, %41 : vector<16x8xf32>
    %c0_18 = arith.constant 0 : index
    %c32 = arith.constant 32 : index
    %43 = vector.load %arg6[%c0_18, %c32] : memref<16x64xf32, #tpu.memory_space<vmem>>, vector<16x8xf32>
    tpu.vector_store %arg6[%c0_18, %c32], %42 {strides = array<i32>} : memref<16x64xf32, #tpu.memory_space<vmem>>, vector<16x8xf32>,
    %44 = vector.extract_strided_slice %15 {offsets = [0, 72], sizes = [16, 8], strides = [1, 1]} : vector<16x128xf32> to vector<16x8xf32>
    %45 = vector.extract_strided_slice %15 {offsets = [0, 80], sizes = [16, 8], strides = [1, 1]} : vector<16x128xf32> to vector<16x8xf32>
    %46 = arith.maximumf %44, %45 : vector<16x8xf32>
    %47 = vector.extract_strided_slice %15 {offsets = [0, 88], sizes = [16, 8], strides = [1, 1]} : vector<16x128xf32> to vector<16x8xf32>
    %48 = arith.maximumf %46, %47 : vector<16x8xf32>
    %c0_19 = arith.constant 0 : index
    %c40 = arith.constant 40 : index
    %49 = vector.load %arg6[%c0_19, %c40] : memref<16x64xf32, #tpu.memory_space<vmem>>, vector<16x8xf32>
    tpu.vector_store %arg6[%c0_19, %c40], %48 {strides = array<i32>} : memref<16x64xf32, #tpu.memory_space<vmem>>, vector<16x8xf32>,
    %50 = vector.extract_strided_slice %15 {offsets = [0, 88], sizes = [16, 8], strides = [1, 1]} : vector<16x128xf32> to vector<16x8xf32>
    %51 = vector.extract_strided_slice %15 {offsets = [0, 96], sizes = [16, 8], strides = [1, 1]} : vector<16x128xf32> to vector<16x8xf32>
    %52 = arith.maximumf %50, %51 : vector<16x8xf32>
    %53 = vector.extract_strided_slice %15 {offsets = [0, 104], sizes = [16, 8], strides = [1, 1]} : vector<16x128xf32> to vector<16x8xf32>
    %54 = arith.maximumf %52, %53 : vector<16x8xf32>
    %c0_20 = arith.constant 0 : index
    %c48 = arith.constant 48 : index
    %55 = vector.load %arg6[%c0_20, %c48] : memref<16x64xf32, #tpu.memory_space<vmem>>, vector<16x8xf32>
    tpu.vector_store %arg6[%c0_20, %c48], %54 {strides = array<i32>} : memref<16x64xf32, #tpu.memory_space<vmem>>, vector<16x8xf32>,
    %56 = vector.extract_strided_slice %15 {offsets = [0, 104], sizes = [16, 8], strides = [1, 1]} : vector<16x128xf32> to vector<16x8xf32>
    %57 = vector.extract_strided_slice %15 {offsets = [0, 112], sizes = [16, 8], strides = [1, 1]} : vector<16x128xf32> to vector<16x8xf32>
    %58 = arith.maximumf %56, %57 : vector<16x8xf32>
    %59 = vector.extract_strided_slice %15 {offsets = [0, 120], sizes = [16, 8], strides = [1, 1]} : vector<16x128xf32> to vector<16x8xf32>
    %60 = arith.maximumf %58, %59 : vector<16x8xf32>
    %c0_21 = arith.constant 0 : index
    %c56 = arith.constant 56 : index
    %61 = vector.load %arg6[%c0_21, %c56] : memref<16x64xf32, #tpu.memory_space<vmem>>, vector<16x8xf32>
    tpu.vector_store %arg6[%c0_21, %c56], %60 {strides = array<i32>} : memref<16x64xf32, #tpu.memory_space<vmem>>, vector<16x8xf32>,
    %c0_22 = arith.constant 0 : index
    %c0_23 = arith.constant 0 : index
    %62 = vector.load %arg6[%c0_22, %c0_23] : memref<16x64xf32, #tpu.memory_space<vmem>>, vector<16x64xf32>
    %63 = vector.extract_strided_slice %62 {offsets = [0, 0], sizes = [1, 64], strides = [1, 1]} : vector<16x64xf32> to vector<1x64xf32>
    %64 = vector.extract_strided_slice %62 {offsets = [1, 0], sizes = [1, 64], strides = [1, 1]} : vector<16x64xf32> to vector<1x64xf32>
    %65 = arith.maximumf %63, %64 : vector<1x64xf32>
    %c0_24 = arith.constant 0 : index
    %c0_25 = arith.constant 0 : index
    %c0_26 = arith.constant 0 : index
    %66 = vector.load %arg4[%c0_24, %c0_25, %c0_26] : memref<1x8x64xf32, #tpu.memory_space<vmem>>, vector<1x1x64xf32>
    %67 = vector.shape_cast %66 : vector<1x1x64xf32> to vector<1x64xf32>
    %68 = vector.shape_cast %65 : vector<1x64xf32> to vector<1x1x64xf32>
    tpu.vector_store %arg4[%c0_24, %c0_25, %c0_26], %68 {strides = array<i32>} : memref<1x8x64xf32, #tpu.memory_space<vmem>>, vector<1x1x64xf32>,
    %69 = vector.extract_strided_slice %62 {offsets = [1, 0], sizes = [1, 64], strides = [1, 1]} : vector<16x64xf32> to vector<1x64xf32>
    %70 = vector.extract_strided_slice %62 {offsets = [2, 0], sizes = [1, 64], strides = [1, 1]} : vector<16x64xf32> to vector<1x64xf32>
    %71 = arith.maximumf %69, %70 : vector<1x64xf32>
    %72 = vector.extract_strided_slice %62 {offsets = [3, 0], sizes = [1, 64], strides = [1, 1]} : vector<16x64xf32> to vector<1x64xf32>
    %73 = arith.maximumf %71, %72 : vector<1x64xf32>
    %c0_27 = arith.constant 0 : index
    %c1_28 = arith.constant 1 : index
    %c0_29 = arith.constant 0 : index
    %74 = vector.load %arg4[%c0_27, %c1_28, %c0_29] : memref<1x8x64xf32, #tpu.memory_space<vmem>>, vector<1x1x64xf32>
    %75 = vector.shape_cast %74 : vector<1x1x64xf32> to vector<1x64xf32>
    %76 = vector.shape_cast %73 : vector<1x64xf32> to vector<1x1x64xf32>
    tpu.vector_store %arg4[%c0_27, %c1_28, %c0_29], %76 {strides = array<i32>} : memref<1x8x64xf32, #tpu.memory_space<vmem>>, vector<1x1x64xf32>,
    %77 = vector.extract_strided_slice %62 {offsets = [3, 0], sizes = [1, 64], strides = [1, 1]} : vector<16x64xf32> to vector<1x64xf32>
    %78 = vector.extract_strided_slice %62 {offsets = [4, 0], sizes = [1, 64], strides = [1, 1]} : vector<16x64xf32> to vector<1x64xf32>
    %79 = arith.maximumf %77, %78 : vector<1x64xf32>
    %80 = vector.extract_strided_slice %62 {offsets = [5, 0], sizes = [1, 64], strides = [1, 1]} : vector<16x64xf32> to vector<1x64xf32>
    %81 = arith.maximumf %79, %80 : vector<1x64xf32>
    %c0_30 = arith.constant 0 : index
    %c2 = arith.constant 2 : index
    %c0_31 = arith.constant 0 : index
    %82 = vector.load %arg4[%c0_30, %c2, %c0_31] : memref<1x8x64xf32, #tpu.memory_space<vmem>>, vector<1x1x64xf32>
    %83 = vector.shape_cast %82 : vector<1x1x64xf32> to vector<1x64xf32>
    %84 = vector.shape_cast %81 : vector<1x64xf32> to vector<1x1x64xf32>
    tpu.vector_store %arg4[%c0_30, %c2, %c0_31], %84 {strides = array<i32>} : memref<1x8x64xf32, #tpu.memory_space<vmem>>, vector<1x1x64xf32>,
    %85 = vector.extract_strided_slice %62 {offsets = [5, 0], sizes = [1, 64], strides = [1, 1]} : vector<16x64xf32> to vector<1x64xf32>
    %86 = vector.extract_strided_slice %62 {offsets = [6, 0], sizes = [1, 64], strides = [1, 1]} : vector<16x64xf32> to vector<1x64xf32>
    %87 = arith.maximumf %85, %86 : vector<1x64xf32>
    %88 = vector.extract_strided_slice %62 {offsets = [7, 0], sizes = [1, 64], strides = [1, 1]} : vector<16x64xf32> to vector<1x64xf32>
    %89 = arith.maximumf %87, %88 : vector<1x64xf32>
    %c0_32 = arith.constant 0 : index
    %c3 = arith.constant 3 : index
    %c0_33 = arith.constant 0 : index
    %90 = vector.load %arg4[%c0_32, %c3, %c0_33] : memref<1x8x64xf32, #tpu.memory_space<vmem>>, vector<1x1x64xf32>
    %91 = vector.shape_cast %90 : vector<1x1x64xf32> to vector<1x64xf32>
    %92 = vector.shape_cast %89 : vector<1x64xf32> to vector<1x1x64xf32>
    tpu.vector_store %arg4[%c0_32, %c3, %c0_33], %92 {strides = array<i32>} : memref<1x8x64xf32, #tpu.memory_space<vmem>>, vector<1x1x64xf32>,
    %93 = vector.extract_strided_slice %62 {offsets = [7, 0], sizes = [1, 64], strides = [1, 1]} : vector<16x64xf32> to vector<1x64xf32>
    %94 = vector.extract_strided_slice %62 {offsets = [8, 0], sizes = [1, 64], strides = [1, 1]} : vector<16x64xf32> to vector<1x64xf32>
    %95 = arith.maximumf %93, %94 : vector<1x64xf32>
    %96 = vector.extract_strided_slice %62 {offsets = [9, 0], sizes = [1, 64], strides = [1, 1]} : vector<16x64xf32> to vector<1x64xf32>
    %97 = arith.maximumf %95, %96 : vector<1x64xf32>
    %c0_34 = arith.constant 0 : index
    %c4_35 = arith.constant 4 : index
    %c0_36 = arith.constant 0 : index
    %98 = vector.load %arg4[%c0_34, %c4_35, %c0_36] : memref<1x8x64xf32, #tpu.memory_space<vmem>>, vector<1x1x64xf32>
    %99 = vector.shape_cast %98 : vector<1x1x64xf32> to vector<1x64xf32>
    %100 = vector.shape_cast %97 : vector<1x64xf32> to vector<1x1x64xf32>
    tpu.vector_store %arg4[%c0_34, %c4_35, %c0_36], %100 {strides = array<i32>} : memref<1x8x64xf32, #tpu.memory_space<vmem>>, vector<1x1x64xf32>,
    %101 = vector.extract_strided_slice %62 {offsets = [9, 0], sizes = [1, 64], strides = [1, 1]} : vector<16x64xf32> to vector<1x64xf32>
    %102 = vector.extract_strided_slice %62 {offsets = [10, 0], sizes = [1, 64], strides = [1, 1]} : vector<16x64xf32> to vector<1x64xf32>
    %103 = arith.maximumf %101, %102 : vector<1x64xf32>
    %104 = vector.extract_strided_slice %62 {offsets = [11, 0], sizes = [1, 64], strides = [1, 1]} : vector<16x64xf32> to vector<1x64xf32>
    %105 = arith.maximumf %103, %104 : vector<1x64xf32>
    %c0_37 = arith.constant 0 : index
    %c5 = arith.constant 5 : index
    %c0_38 = arith.constant 0 : index
    %106 = vector.load %arg4[%c0_37, %c5, %c0_38] : memref<1x8x64xf32, #tpu.memory_space<vmem>>, vector<1x1x64xf32>
    %107 = vector.shape_cast %106 : vector<1x1x64xf32> to vector<1x64xf32>
    %108 = vector.shape_cast %105 : vector<1x64xf32> to vector<1x1x64xf32>
    tpu.vector_store %arg4[%c0_37, %c5, %c0_38], %108 {strides = array<i32>} : memref<1x8x64xf32, #tpu.memory_space<vmem>>, vector<1x1x64xf32>,
    %109 = vector.extract_strided_slice %62 {offsets = [11, 0], sizes = [1, 64], strides = [1, 1]} : vector<16x64xf32> to vector<1x64xf32>
    %110 = vector.extract_strided_slice %62 {offsets = [12, 0], sizes = [1, 64], strides = [1, 1]} : vector<16x64xf32> to vector<1x64xf32>
    %111 = arith.maximumf %109, %110 : vector<1x64xf32>
    %112 = vector.extract_strided_slice %62 {offsets = [13, 0], sizes = [1, 64], strides = [1, 1]} : vector<16x64xf32> to vector<1x64xf32>
    %113 = arith.maximumf %111, %112 : vector<1x64xf32>
    %c0_39 = arith.constant 0 : index
    %c6 = arith.constant 6 : index
    %c0_40 = arith.constant 0 : index
    %114 = vector.load %arg4[%c0_39, %c6, %c0_40] : memref<1x8x64xf32, #tpu.memory_space<vmem>>, vector<1x1x64xf32>
    %115 = vector.shape_cast %114 : vector<1x1x64xf32> to vector<1x64xf32>
    %116 = vector.shape_cast %113 : vector<1x64xf32> to vector<1x1x64xf32>
    tpu.vector_store %arg4[%c0_39, %c6, %c0_40], %116 {strides = array<i32>} : memref<1x8x64xf32, #tpu.memory_space<vmem>>, vector<1x1x64xf32>,
    %117 = vector.extract_strided_slice %62 {offsets = [13, 0], sizes = [1, 64], strides = [1, 1]} : vector<16x64xf32> to vector<1x64xf32>
    %118 = vector.extract_strided_slice %62 {offsets = [14, 0], sizes = [1, 64], strides = [1, 1]} : vector<16x64xf32> to vector<1x64xf32>
    %119 = arith.maximumf %117, %118 : vector<1x64xf32>
    %120 = vector.extract_strided_slice %62 {offsets = [15, 0], sizes = [1, 64], strides = [1, 1]} : vector<16x64xf32> to vector<1x64xf32>
    %121 = arith.maximumf %119, %120 : vector<1x64xf32>
    %c0_41 = arith.constant 0 : index
    %c7 = arith.constant 7 : index
    %c0_42 = arith.constant 0 : index
    %122 = vector.load %arg4[%c0_41, %c7, %c0_42] : memref<1x8x64xf32, #tpu.memory_space<vmem>>, vector<1x1x64xf32>
    %123 = vector.shape_cast %122 : vector<1x1x64xf32> to vector<1x64xf32>
    %124 = vector.shape_cast %121 : vector<1x64xf32> to vector<1x1x64xf32>
    tpu.vector_store %arg4[%c0_41, %c7, %c0_42], %124 {strides = array<i32>} : memref<1x8x64xf32, #tpu.memory_space<vmem>>, vector<1x1x64xf32>,
    return
  }
  func.func @transform_0(%arg0: i32) -> (i32, i32, i32) {
    %c0_i32 = arith.constant 0 : i32
    %c0_i32_0 = arith.constant 0 : i32
    %c0_i32_1 = arith.constant 0 : i32
    return %arg0, %c0_i32, %c0_i32_0 : i32, i32, i32
  }
  func.func @transform_1(%arg0: i32) -> (i32, i32) {
    %c0_i32 = arith.constant 0 : i32
    %c0_i32_0 = arith.constant 0 : i32
    %c0_i32_1 = arith.constant 0 : i32
    return %c0_i32, %c0_i32_0 : i32, i32
  }
  func.func @transform_2(%arg0: i32) -> (i32, i32) {
    %c0_i32 = arith.constant 0 : i32
    %c0_i32_0 = arith.constant 0 : i32
    %c0_i32_1 = arith.constant 0 : i32
    return %c0_i32, %c0_i32_0 : i32, i32
  }
  func.func @transform_3(%arg0: i32) -> (i32, i32, i32) {
    %c0_i32 = arith.constant 0 : i32
    %c0_i32_0 = arith.constant 0 : i32
    %c0_i32_1 = arith.constant 0 : i32
    return %arg0, %c0_i32, %c0_i32_0 : i32, i32, i32
  }
}

module attributes {stable_mosaic.version = 11 : i64} {
  func.func @_res_block_kernel(%arg0: i32, %arg1: memref<1x8x64xf32, #tpu.memory_space<vmem>>, %arg2: memref<384x64xbf16, #tpu.memory_space<vmem>>, %arg3: memref<1x64xf32, #tpu.memory_space<vmem>>, %arg4: memref<384x64xbf16, #tpu.memory_space<vmem>>, %arg5: memref<1x64xf32, #tpu.memory_space<vmem>>, %arg6: memref<1x8x64xf32, #tpu.memory_space<vmem>>, %arg7: memref<8x384xf32, #tpu.memory_space<vmem>>) attributes {dimension_semantics = [#tpu.dimension_semantics<parallel>], iteration_bounds = array<i64: 2>, scalar_prefetch = 0 : i64, scratch_operands = 1 : i64, tpu.core_type = #tpu.core_type<tc>, window_params = [{transform_indices = @transform_0, window_bounds = array<i64: 1, 8, 64>}, {pipeline_mode = #tpu.pipeline_mode<synchronous>, transform_indices = @transform_1, window_bounds = array<i64: 384, 64>}, {pipeline_mode = #tpu.pipeline_mode<synchronous>, transform_indices = @transform_2, window_bounds = array<i64: 1, 64>}, {pipeline_mode = #tpu.pipeline_mode<synchronous>, transform_indices = @transform_3, window_bounds = array<i64: 384, 64>}, {pipeline_mode = #tpu.pipeline_mode<synchronous>, transform_indices = @transform_4, window_bounds = array<i64: 1, 64>}, {transform_indices = @transform_5, window_bounds = array<i64: 1, 8, 64>}]} {
    %c0 = arith.constant 0 : index
    %c0_0 = arith.constant 0 : index
    %c0_1 = arith.constant 0 : index
    %0 = vector.load %arg1[%c0, %c0_0, %c0_1] : memref<1x8x64xf32, #tpu.memory_space<vmem>>, vector<1x8x64xf32>
    %1 = vector.shape_cast %0 : vector<1x8x64xf32> to vector<8x64xf32>
    %cst = arith.constant 0.000000e+00 : f32
    %2 = vector.broadcast %cst : f32 to vector<8x384xf32>
    %c0_2 = arith.constant 0 : index
    %c0_3 = arith.constant 0 : index
    %3 = vector.load %arg7[%c0_2, %c0_3] : memref<8x384xf32, #tpu.memory_space<vmem>>, vector<8x384xf32>
    tpu.vector_store %arg7[%c0_2, %c0_3], %2 {strides = array<i32>} : memref<8x384xf32, #tpu.memory_space<vmem>>, vector<8x384xf32>,
    %cst_4 = arith.constant 0.000000e+00 : f32
    %4 = vector.broadcast %cst_4 : f32 to vector<8x64xf32>
    %5 = arith.maximumf %1, %4 : vector<8x64xf32>
    %6 = vector.extract_strided_slice %5 {offsets = [0, 0], sizes = [7, 64], strides = [1, 1]} : vector<8x64xf32> to vector<7x64xf32>
    %c1 = arith.constant 1 : index
    %c8 = arith.constant 8 : index
    %7 = vector.load %arg7[%c1, %c8] : memref<8x384xf32, #tpu.memory_space<vmem>>, vector<7x64xf32>
    tpu.vector_store %arg7[%c1, %c8], %6 {strides = array<i32>} : memref<8x384xf32, #tpu.memory_space<vmem>>, vector<7x64xf32>,
    %c0_5 = arith.constant 0 : index
    %c136 = arith.constant 136 : index
    %8 = vector.load %arg7[%c0_5, %c136] : memref<8x384xf32, #tpu.memory_space<vmem>>, vector<8x64xf32>
    tpu.vector_store %arg7[%c0_5, %c136], %5 {strides = array<i32>} : memref<8x384xf32, #tpu.memory_space<vmem>>, vector<8x64xf32>,
    %9 = vector.extract_strided_slice %5 {offsets = [1, 0], sizes = [7, 64], strides = [1, 1]} : vector<8x64xf32> to vector<7x64xf32>
    %c0_6 = arith.constant 0 : index
    %c264 = arith.constant 264 : index
    %10 = vector.load %arg7[%c0_6, %c264] : memref<8x384xf32, #tpu.memory_space<vmem>>, vector<7x64xf32>
    tpu.vector_store %arg7[%c0_6, %c264], %9 {strides = array<i32>} : memref<8x384xf32, #tpu.memory_space<vmem>>, vector<7x64xf32>,
    %c0_7 = arith.constant 0 : index
    %c0_8 = arith.constant 0 : index
    %11 = vector.load %arg7[%c0_7, %c0_8] : memref<8x384xf32, #tpu.memory_space<vmem>>, vector<8x384xf32>
    %12 = arith.truncf %11 : vector<8x384xf32> to vector<8x384xbf16>
    %c0_9 = arith.constant 0 : index
    %c0_10 = arith.constant 0 : index
    %13 = vector.load %arg2[%c0_9, %c0_10] : memref<384x64xbf16, #tpu.memory_space<vmem>>, vector<384x64xbf16>
    %cst_11 = arith.constant dense<0.000000e+00> : vector<8x64xf32>
    %14 = tpu.matmul %12, %13, %cst_11 {dimension_numbers = #tpu.dot_dimension_numbers<[1], [0], [0], [1], [0, 0, 1, 1], [], []>} : vector<8x384xbf16>, vector<384x64xbf16>, vector<8x64xf32> -> vector<8x64xf32>
    %c0_12 = arith.constant 0 : index
    %c0_13 = arith.constant 0 : index
    %15 = vector.load %arg3[%c0_12, %c0_13] : memref<1x64xf32, #tpu.memory_space<vmem>>, vector<1x64xf32>
    %16 = vector.broadcast %15 : vector<1x64xf32> to vector<8x64xf32>
    %17 = arith.addf %14, %16 : vector<8x64xf32>
    %cst_14 = arith.constant 0.000000e+00 : f32
    %18 = vector.broadcast %cst_14 : f32 to vector<8x64xf32>
    %19 = arith.maximumf %17, %18 : vector<8x64xf32>
    %20 = vector.extract_strided_slice %19 {offsets = [0, 0], sizes = [7, 64], strides = [1, 1]} : vector<8x64xf32> to vector<7x64xf32>
    %c1_15 = arith.constant 1 : index
    %c8_16 = arith.constant 8 : index
    %21 = vector.load %arg7[%c1_15, %c8_16] : memref<8x384xf32, #tpu.memory_space<vmem>>, vector<7x64xf32>
    tpu.vector_store %arg7[%c1_15, %c8_16], %20 {strides = array<i32>} : memref<8x384xf32, #tpu.memory_space<vmem>>, vector<7x64xf32>,
    %c0_17 = arith.constant 0 : index
    %c136_18 = arith.constant 136 : index
    %22 = vector.load %arg7[%c0_17, %c136_18] : memref<8x384xf32, #tpu.memory_space<vmem>>, vector<8x64xf32>
    tpu.vector_store %arg7[%c0_17, %c136_18], %19 {strides = array<i32>} : memref<8x384xf32, #tpu.memory_space<vmem>>, vector<8x64xf32>,
    %23 = vector.extract_strided_slice %19 {offsets = [1, 0], sizes = [7, 64], strides = [1, 1]} : vector<8x64xf32> to vector<7x64xf32>
    %c0_19 = arith.constant 0 : index
    %c264_20 = arith.constant 264 : index
    %24 = vector.load %arg7[%c0_19, %c264_20] : memref<8x384xf32, #tpu.memory_space<vmem>>, vector<7x64xf32>
    tpu.vector_store %arg7[%c0_19, %c264_20], %23 {strides = array<i32>} : memref<8x384xf32, #tpu.memory_space<vmem>>, vector<7x64xf32>,
    %c0_21 = arith.constant 0 : index
    %c0_22 = arith.constant 0 : index
    %25 = vector.load %arg7[%c0_21, %c0_22] : memref<8x384xf32, #tpu.memory_space<vmem>>, vector<8x384xf32>
    %26 = arith.truncf %25 : vector<8x384xf32> to vector<8x384xbf16>
    %c0_23 = arith.constant 0 : index
    %c0_24 = arith.constant 0 : index
    %27 = vector.load %arg4[%c0_23, %c0_24] : memref<384x64xbf16, #tpu.memory_space<vmem>>, vector<384x64xbf16>
    %cst_25 = arith.constant dense<0.000000e+00> : vector<8x64xf32>
    %28 = tpu.matmul %26, %27, %cst_25 {dimension_numbers = #tpu.dot_dimension_numbers<[1], [0], [0], [1], [0, 0, 1, 1], [], []>} : vector<8x384xbf16>, vector<384x64xbf16>, vector<8x64xf32> -> vector<8x64xf32>
    %c0_26 = arith.constant 0 : index
    %c0_27 = arith.constant 0 : index
    %29 = vector.load %arg5[%c0_26, %c0_27] : memref<1x64xf32, #tpu.memory_space<vmem>>, vector<1x64xf32>
    %30 = vector.broadcast %29 : vector<1x64xf32> to vector<8x64xf32>
    %31 = arith.addf %28, %30 : vector<8x64xf32>
    %32 = arith.addf %1, %31 : vector<8x64xf32>
    %c0_28 = arith.constant 0 : index
    %c0_29 = arith.constant 0 : index
    %c0_30 = arith.constant 0 : index
    %33 = vector.load %arg6[%c0_28, %c0_29, %c0_30] : memref<1x8x64xf32, #tpu.memory_space<vmem>>, vector<1x8x64xf32>
    %34 = vector.shape_cast %33 : vector<1x8x64xf32> to vector<8x64xf32>
    %35 = vector.shape_cast %32 : vector<8x64xf32> to vector<1x8x64xf32>
    tpu.vector_store %arg6[%c0_28, %c0_29, %c0_30], %35 {strides = array<i32>} : memref<1x8x64xf32, #tpu.memory_space<vmem>>, vector<1x8x64xf32>,
    return
  }
  func.func @transform_0(%arg0: i32) -> (i32, i32, i32) {
    %c0_i32 = arith.constant 0 : i32
    %c0_i32_0 = arith.constant 0 : i32
    %c0_i32_1 = arith.constant 0 : i32
    return %arg0, %c0_i32, %c0_i32_0 : i32, i32, i32
  }
  func.func @transform_1(%arg0: i32) -> (i32, i32) {
    %c0_i32 = arith.constant 0 : i32
    %c0_i32_0 = arith.constant 0 : i32
    %c0_i32_1 = arith.constant 0 : i32
    return %c0_i32, %c0_i32_0 : i32, i32
  }
  func.func @transform_2(%arg0: i32) -> (i32, i32) {
    %c0_i32 = arith.constant 0 : i32
    %c0_i32_0 = arith.constant 0 : i32
    %c0_i32_1 = arith.constant 0 : i32
    return %c0_i32, %c0_i32_0 : i32, i32
  }
  func.func @transform_3(%arg0: i32) -> (i32, i32) {
    %c0_i32 = arith.constant 0 : i32
    %c0_i32_0 = arith.constant 0 : i32
    %c0_i32_1 = arith.constant 0 : i32
    return %c0_i32, %c0_i32_0 : i32, i32
  }
  func.func @transform_4(%arg0: i32) -> (i32, i32) {
    %c0_i32 = arith.constant 0 : i32
    %c0_i32_0 = arith.constant 0 : i32
    %c0_i32_1 = arith.constant 0 : i32
    return %c0_i32, %c0_i32_0 : i32, i32
  }
  func.func @transform_5(%arg0: i32) -> (i32, i32, i32) {
    %c0_i32 = arith.constant 0 : i32
    %c0_i32_0 = arith.constant 0 : i32
    %c0_i32_1 = arith.constant 0 : i32
    return %arg0, %c0_i32, %c0_i32_0 : i32, i32, i32
  }
}

</mosaic_0001>

<bundles_post_ra>
// kernel: tile.28
= control target key start
LH: loop header
LB: loop body
LE: loop exit
PB: predicated region body
PF: predicated region fallthrough
CT: control target
= control target key end

     0   :  { %s28_s0 = inlined_call_operand.vmem [shape: f32[8], index: 0, kind: input, shape index: {}]   ;;  %s29_s1 = inlined_call_operand.vmem [shape: f32[16,8], index: 1, kind: output, shape index: {}]  }
   0x1   :  { %v4_v0 = vld [vmem:[%s28_s0] ss:$0 sm:$0xff] }
   0x2   :  { %5 = vst [vmem:[%s29_s1] sm:$0xff] %v4_v0  ;;  %8 = vst [vmem:[%s29_s1 + $0x8] sm:$0xff] %v4_v0 }

// kernel: tile.29
= control target key start
LH: loop header
LB: loop body
LE: loop exit
PB: predicated region body
PF: predicated region fallthrough
CT: control target
= control target key end

     0   :  { %s131_s10 = smov 120   ;;  %s132_s11 = smov 104   ;;  %vm3_vm0 = vcmask 64512   ;;  %vm9_vm1 = vcmask 1048512   ;;  %vm15_vm2 = vcmask 982912   ;;  %vm21_vm3 = vcmask 917312   ;;  %s207_s0 = inlined_call_operand.vmem [shape: f32[16,8], index: 0, kind: input, shape index: {}]   ;;  %s208_s1 = inlined_call_operand.vmem [shape: f32[1,128], index: 1, kind: output, shape index: {}]  }
   0x1   :  { %v101_v0 = vld [vmem:[%s207_s0 + $0xf] sm:$0x1]   ;;  %v103_v1 = vld [vmem:[%s207_s0 + $0xd] sm:$0x1]   ;;  %v102_v2 = vld [vmem:[%s207_s0 + $0xe] sm:$0x1]  }
   0x2   :  { %7 = vrot.lane.b32.xlu0 %v101_v0, %s131_s10  ;;  %19 = vrot.lane.b32.xlu1 %v103_v1, %s132_s11  ;;  %v104_v3 = vld [vmem:[%s207_s0 + $0xc] sm:$0x1]   ;;  %s133_s16 = smov 112   ;;  %s134_s17 = smov 96   ;;  %v105_v4 = vld [vmem:[%s207_s0 + $0xb] sm:$0x1]  }
   0x3   :  { %v106_v5 = vld [vmem:[%s207_s0 + $0xa] sm:$0x1]   ;;  %v2_v6 = vld [vmem:[%s207_s0] sm:$0x1]   ;;  %s135_s24 = smov 88   ;;  %s136_s25 = smov 80  }
   0x4   :  { %4 = vst.msk [vmem:[#allocation0] sm:$0x1] %vm3_vm0, %v2_v6   ;;  %v107_v7 = vld [vmem:[%s207_s0 + $0x9] sm:$0x1]   ;;  %v108_v8 = vld [vmem:[%s207_s0 + $0x8] sm:$0x1]  }
   0x5   :  { %s137_s30 = smov 72   ;;  %s138_s2 = smov 64   ;;  %v109_v9 = vld [vmem:[%s207_s0 + $0x7] sm:$0x1]   ;;  %v110_v10 = vld [vmem:[%s207_s0 + $0x6] sm:$0x1]  }
   0x6   :  { %13 = vrot.lane.b32.xlu0 %v102_v2, %s133_s16  ;;  %25 = vrot.lane.b32.xlu1 %v104_v3, %s134_s17  ;;  %s139_s7 = smov 56   ;;  %s140_s8 = smov 48   ;;  %v111_v11 = vld [vmem:[%s207_s0 + $0x5] sm:$0x1]   ;;  %v112_v12 = vld [vmem:[%s207_s0 + $0x4] sm:$0x1]  }
   0x7   :  { %s141_s13 = smov 40   ;;  %s142_s14 = smov 32   ;;  %v113_v13 = vld [vmem:[%s207_s0 + $0x3] sm:$0x1]   ;;  %v114_v14 = vld [vmem:[%s207_s0 + $0x2] sm:$0x1]  }
   0x8   :  { %s143_s19 = smov 24   ;;  %s144_s20 = smov 16   ;;  %v115_v15 = vld [vmem:[%s207_s0 + $0x1] sm:$0x1]   ;;  %vm27_vm4 = vcmask 851712   ;;  %vm33_vm5 = vcmask 786112  }
   0x9   :  { %s145_s0 = smov 8   ;;  %vm39_vm6 = vcmask 720512   ;;  %vm45_vm7 = vcmask 654912   ;;  %vm51_vm8 = vcmask 589312   ;;  %vm57_vm9 = vcmask 523712  }
   0xa   :  { %31 = vrot.lane.b32.xlu0 %v105_v4, %s135_s24  ;;  %37 = vrot.lane.b32.xlu1 %v106_v5, %s136_s25  ;;  %vm63_vm10 = vcmask 458112   ;;  %vm69_vm11 = vcmask 392512   ;;  %vm75_vm12 = vcmask 326912   ;;  %vm81_vm13 = vcmask 261312  }
   0xb   :  { %vm87_vm14 = vcmask 195712   ;;  %vm93_vm15 = vcmask 130112  }
   0xe   :  { %43 = vrot.lane.b32.xlu0 %v107_v7, %s137_s30  ;;  %49 = vrot.lane.b32.xlu1 %v108_v8, %s138_s2 }
  0x12   :  { %55 = vrot.lane.b32.xlu0 %v109_v9, %s139_s7  ;;  %61 = vrot.lane.b32.xlu1 %v110_v10, %s140_s8 }
  0x16   :  { %67 = vrot.lane.b32.xlu0 %v111_v11, %s141_s13  ;;  %73 = vrot.lane.b32.xlu1 %v112_v12, %s142_s14 }
  0x1a   :  { %79 = vrot.lane.b32.xlu0 %v113_v13, %s143_s19  ;;  %85 = vrot.lane.b32.xlu1 %v114_v14, %s144_s20 }
  0x1e   :  { %91 = vrot.lane.b32.xlu0 %v115_v15, %s145_s0 }
  0x74   :  { %v8_v16 = vpop.permute.xlu0 %7   ;;  %v20_v17 = vpop.permute.xlu1 %19  }
  0x75   :  { %10 = vst.msk [vmem:[#allocation0] sm:$0x1] %vm9_vm1, %v8_v16  }
  0x78   :  { %v14_v18 = vpop.permute.xlu0 %13   ;;  %v26_v19 = vpop.permute.xlu1 %25  }
  0x79   :  { %16 = vst.msk [vmem:[#allocation0] sm:$0x1] %vm15_vm2, %v14_v18  }
  0x7a   :  { %22 = vst.msk [vmem:[#allocation0] sm:$0x1] %vm21_vm3, %v20_v17  }
  0x7b   :  { %28 = vst.msk [vmem:[#allocation0] sm:$0x1] %vm27_vm4, %v26_v19  }
  0x7c   :  { %v32_v20 = vpop.permute.xlu0 %31   ;;  %v38_v21 = vpop.permute.xlu1 %37  }
  0x7d   :  { %34 = vst.msk [vmem:[#allocation0] sm:$0x1] %vm33_vm5, %v32_v20  }
  0x7e   :  { %40 = vst.msk [vmem:[#allocation0] sm:$0x1] %vm39_vm6, %v38_v21  }
  0x80   :  { %v44_v22 = vpop.permute.xlu0 %43   ;;  %v50_v23 = vpop.permute.xlu1 %49  }
  0x81   :  { %46 = vst.msk [vmem:[#allocation0] sm:$0x1] %vm45_vm7, %v44_v22  }
  0x82   :  { %52 = vst.msk [vmem:[#allocation0] sm:$0x1] %vm51_vm8, %v50_v23  }
  0x84   :  { %v56_v24 = vpop.permute.xlu0 %55   ;;  %v62_v25 = vpop.permute.xlu1 %61  }
  0x85   :  { %58 = vst.msk [vmem:[#allocation0] sm:$0x1] %vm57_vm9, %v56_v24  }
  0x86   :  { %64 = vst.msk [vmem:[#allocation0] sm:$0x1] %vm63_vm10, %v62_v25  }
  0x88   :  { %v68_v26 = vpop.permute.xlu0 %67   ;;  %v74_v27 = vpop.permute.xlu1 %73  }
  0x89   :  { %70 = vst.msk [vmem:[#allocation0] sm:$0x1] %vm69_vm11, %v68_v26  }
  0x8a   :  { %76 = vst.msk [vmem:[#allocation0] sm:$0x1] %vm75_vm12, %v74_v27  }
  0x8c   :  { %v80_v28 = vpop.permute.xlu0 %79   ;;  %v86_v29 = vpop.permute.xlu1 %85  }
  0x8d   :  { %82 = vst.msk [vmem:[#allocation0] sm:$0x1] %vm81_vm13, %v80_v28  }
  0x8e   :  { %88 = vst.msk [vmem:[#allocation0] sm:$0x1] %vm87_vm14, %v86_v29  }
  0x90   :  { %v92_v30 = vpop.permute.xlu0 %91  }
  0x91   :  { %94 = vst.msk [vmem:[#allocation0] sm:$0x1] %vm93_vm15, %v92_v30  }
  0x98   :  { %v98_v31 = vld [vmem:[#allocation0] sm:$0x1] }
  0x99   :  { %100 = vst [vmem:[%s208_s1] sm:$0x1] %v98_v31 }

// kernel: cnn_down_stack_forward.3
= control target key start
LH: loop header
LB: loop body
LE: loop exit
PB: predicated region body
PF: predicated region fallthrough
CT: control target
= control target key end

     0   :  { %s834_s12 = smov 0   ;;  %s952_s0 = inlined_call_operand.vmem [shape: f32[2,16,64], index: 0, kind: input, shape index: {}]   ;;  %s953_s1 = inlined_call_operand.vmem [shape: bf16[384,128], index: 1, kind: input, shape index: {}]   ;;  %s954_s2 = inlined_call_operand.vmem [shape: f32[1,128], index: 2, kind: input, shape index: {}]   ;;  %s955_s3 = inlined_call_operand.vmem [shape: f32[2,8,64], index: 3, kind: output, shape index: {}]  }
   0x1 LB: > { %s669_s13 = sadd.s32 4294967295, %s803_s12   ;;  %p673_p0 = scmp.ge.s32.totalorder %s803_s12, 1  ;;  %s803_s12 = sphi %s834_s12, %s13_s12  }
   0x2   : > { %p137_p1 = scmp.lt.s32.totalorder %s803_s12, 3 }
   0x4   : > { %p138_p2 = pnand %p673_p0, %p137_p1 }
   0x5   : > { %p160_p3 = scmp.lt.s32.totalorder (!%p138_p2), %s669_s13, 1  ;;  %v773_v0 = vld [vmem:[%s953_s1 + $0x40] sm:$0xff] (!%p138_p2)   ;;  %v805_v2 = vmov (!%p138_p2), 0.0   ;;  %v775_v3 = vld [vmem:[%s953_s1 + $0x48] sm:$0xff] (!%p138_p2)   ;;  %vm180_vm0 = vcmask (!%p138_p2), 1040384   ;;  %s806_s28 = smov (!%p138_p2), 4  }
   0x6   : > { %141 = sbr.rel (%p138_p2) target bundleno = 643 (0x283), region = 32  ;;  %v774_v1 = vld [vmem:[%s953_s1] sm:$0xff] (!%p138_p2)   ;;  %736 = vmatprep.subr.bf16.mxu1 (!%p138_p2), %v805_v2  ;;  %170 = vst [vmem:[#allocation2] sm:$0xff] (!%p138_p2), %v805_v2  ;;  %171 = vst [vmem:[#allocation2 + $0x8] sm:$0xff] (!%p138_p2), %v805_v2  ;;  %705 = vmatprep.subr.bf16.mxu0 (!%p138_p2), %v773_v0  ;;  %v776_v4 = vld [vmem:[%s953_s1 + $0x8] sm:$0xff] (!%p138_p2)   ;;  %vm202_vm1 = vcmask (!%p138_p2), 1046528  }
   0x7   : > { %172 = vst [vmem:[#allocation2 + $0x10] sm:$0xff] (!%p138_p2), %v805_v2  ;;  %173 = vst [vmem:[#allocation2 + $0x18] sm:$0xff] (!%p138_p2), %v805_v2  ;;  %706 = vmatpush3.bf16.msra.mxu0 (!%p138_p2), %v774_v1  ;;  %v777_v5 = vld [vmem:[%s953_s1 + $0x80] sm:$0xff] (!%p138_p2)   ;;  %v778_v12 = vld [vmem:[%s953_s1 + $0x50] sm:$0xff] (!%p138_p2)   ;;  %vm807_vm2 = vmmov (!%p138_p2), 0   ;;  %vm192_vm3 = vcmask (!%p138_p2), 556064  }
   0x8   : > { %174 = vst [vmem:[#allocation2 + $0x20] sm:$0xff] (!%p138_p2), %v805_v2  ;;  %175 = vst [vmem:[#allocation2 + $0x28] sm:$0xff] (!%p138_p2), %v805_v2  ;;  %707 = vmatprep.subr.bf16.mxu0 (!%p138_p2), %v775_v3  ;;  %737 = vmatpush3.bf16.msra.mxu1 (!%p138_p2), %v777_v5  ;;  %v779_v13 = vld [vmem:[%s953_s1 + $0x10] sm:$0xff] (!%p138_p2)   ;;  %v780_v14 = vld [vmem:[%s953_s1 + $0x88] sm:$0xff] (!%p138_p2)   ;;  %vm190_vm4 = vcmask (!%p138_p2), 556065   ;;  %vm213_vm5 = vcmask (!%p138_p2), 555040  }
   0x9   : > { %738 = vmatprep.subr.bf16.mxu1 (!%p138_p2), %v805_v2  ;;  %v781_v16 = vld [vmem:[%s953_s1 + $0x58] sm:$0xff] (!%p138_p2)   ;;  %v783_v19 = vld [vmem:[%s953_s1 + $0x90] sm:$0xff] (!%p138_p2)   ;;  %v784_v20 = vld [vmem:[%s953_s1 + $0x60] sm:$0xff] (!%p138_p2)   ;;  %752 = vmatprep.mubr.msk.bf16.mxu1 (!%p138_p2), %vm807_vm2, %v805_v2  ;;  %s808_s19 = smov (!%p138_p2), 120   ;;  %vm515_vm6 = vcmask (!%p138_p2), 64512   ;;  %vm526_vm7 = vcmask (!%p138_p2), 130112  }
   0xa   : > { %v782_v17 = vld [vmem:[%s953_s1 + $0x18] sm:$0xff] (!%p138_p2)   ;;  %v785_v22 = vld [vmem:[%s953_s1 + $0x20] sm:$0xff] (!%p138_p2)   ;;  %v787_v23 = vld [vmem:[%s953_s1 + $0x68] sm:$0xff] (!%p138_p2)   ;;  %s810_s21 = smov (!%p138_p2), 104   ;;  %s811_s22 = smov (!%p138_p2), 96   ;;  %vm537_vm8 = vcmask (!%p138_p2), 195712  }
   0xb   : > { %708 = vmatpush3.bf16.msra.mxu0 (!%p138_p2), %v776_v4  ;;  %v786_v21 = vld [vmem:[%s953_s1 + $0x98] sm:$0xff] (!%p138_p2)   ;;  %v789_v24 = vld [vmem:[%s953_s1 + $0xa0] sm:$0xff] (!%p138_p2)   ;;  %v788_v25 = vld [vmem:[%s953_s1 + $0x28] sm:$0xff] (!%p138_p2)   ;;  %s812_s23 = smov (!%p138_p2), 88   ;;  %s813_s24 = smov (!%p138_p2), 80   ;;  %vm546_vm9 = vcmask (!%p138_p2), 261312  }
   0xc   : > { %709 = vmatprep.subr.bf16.mxu0 (!%p138_p2), %v778_v12  ;;  %739 = vmatpush3.bf16.msra.mxu1 (!%p138_p2), %v780_v14  ;;  %v790_v26 = vld [vmem:[%s953_s1 + $0x70] sm:$0xff] (!%p138_p2)   ;;  %v792_v27 = vld [vmem:[%s953_s1 + $0xa8] sm:$0xff] (!%p138_p2)   ;;  %v793_v29 = vld [vmem:[%s953_s1 + $0x78] sm:$0xff] (!%p138_p2)   ;;  %vm555_vm10 = vcmask (!%p138_p2), 326912   ;;  %vm564_vm11 = vcmask (!%p138_p2), 392512   ;;  %vm573_vm12 = vcmask (!%p138_p2), 458112  }
   0xd   : > { %s957_s13 = smov (!%p160_p3, %s669_s13), 1  ;;  %740 = vmatprep.subr.bf16.mxu1 %v805_v2  ;;  %v791_v28 = vld [vmem:[%s953_s1 + $0x30] sm:$0xff]   ;;  %v794_v31 = vld [vmem:[%s953_s1 + $0x38] sm:$0xff]   ;;  %v677_v50 = vld [vmem:[%s954_s2] ss:$0 sm:$0xff]  ;;  %vm582_vm13 = vcmask 523712  }
   0xe   : > { %s704_s20 = sshll.u32 %s957_s13, 4  ;;  %v795_v30 = vld [vmem:[%s953_s1 + $0xb0] sm:$0xff]   ;;  %v796_v32 = vld [vmem:[%s953_s1 + $0xb8] sm:$0xff]   ;;  %s676_s25 = sshll.u32 %s957_s13, 3  ;;  %vm591_vm14 = vcmask 516096   ;;  %vm596_vm15 = vcmask 517121  }
   0xf   : > { %s164_s27 = scalar_lea.vmem %s952_s0, %s704_s20  ;;  %710 = vmatpush3.bf16.msra.mxu0 %v779_v13  ;;  %s809_s20 = smov 112   ;;  %vm609_vm2 = vcmask 523271  }
  0x10   : > { %v176_v6 = vld [vmem:[%s164_s27] sm:$0xff]  ;;  %v177_v7 = vld [vmem:[%s164_s27 + $0x8] sm:$0xff]  ;;  %711 = vmatprep.subr.bf16.mxu0 %v781_v16  ;;  %741 = vmatpush3.bf16.msra.mxu1 %v783_v19  ;;  %s168_s29 = scalar_lea.vmem %s955_s3, %s676_s25 }
  0x11   : > { %194 = vrot.lane.b32.xlu0 %v176_v6, %s806_s28  ;;  %v203_v8 = vrot.slane %v176_v6, 1  ;;  %v181_v9 = vrot.slane %v176_v6, 7  ;;  %v182_v10 = vrot.slane %v177_v7, 7  ;;  %v204_v11 = vrot.slane %v177_v7, 1  ;;  %742 = vmatprep.subr.bf16.mxu1 %v805_v2 }
  0x13   : > { %184 = vrot.lane.b32.xlu1 %v181_v9, %s806_s28  ;;  %v183_v15 = vsel %vm180_vm0, %v181_v9, %v182_v10  ;;  %v205_v18 = vsel %vm202_vm1, %v203_v8, %v204_v11  ;;  %712 = vmatpush3.bf16.msra.mxu0 %v782_v17  ;;  %vm598_vm0 = vcmask 519171   ;;  %vm600_vm1 = vcmask 521221  }
  0x14   : > { %713 = vmatprep.subr.bf16.mxu0 %v784_v20  ;;  %743 = vmatpush3.bf16.msra.mxu1 %v786_v21 }
  0x15   : > { %196 = vrot.lane.b32.xlu0 %v177_v7, %s806_s28  ;;  %744 = vmatprep.subr.bf16.mxu1 %v805_v2 }
  0x17   : > { %186 = vrot.lane.b32.xlu1 %v183_v15, %s806_s28  ;;  %714 = vmatpush3.bf16.msra.mxu0 %v785_v22 }
  0x18   : > { %715 = vmatprep.subr.bf16.mxu0 %v787_v23  ;;  %745 = vmatpush3.bf16.msra.mxu1 %v789_v24 }
  0x19   : > { %206 = vrot.lane.b32.xlu0 %v205_v18, %s806_s28  ;;  %746 = vmatprep.subr.bf16.mxu1 %v805_v2 }
  0x1b   : > { %208 = vrot.lane.b32.xlu1 %v204_v11, %s806_s28  ;;  %716 = vmatpush3.bf16.msra.mxu0 %v788_v25 }
  0x1c   : > { %717 = vmatprep.subr.bf16.mxu0 %v790_v26  ;;  %747 = vmatpush3.bf16.msra.mxu1 %v792_v27 }
  0x1d   : > { %748 = vmatprep.subr.bf16.mxu1 %v805_v2 }
  0x1f   : > { %718 = vmatpush3.bf16.msra.mxu0 %v791_v28 }
  0x20   : > { %719 = vmatprep.subr.bf16.mxu0 %v793_v29  ;;  %749 = vmatpush3.bf16.msra.mxu1 %v795_v30 }
  0x21   : > { %750 = vmatprep.subr.bf16.mxu1 %v805_v2 }
  0x23   : > { %720 = vmatpush3.bf16.msra.mxu0 %v794_v31 }
  0x24   : > { %751 = vmatpush3.bf16.msra.mxu1 %v796_v32 }
  0x83   : > { %v195_v33 = vpop.permute.xlu0 %194 }
  0x84   : > { %200 = vst.msk [vmem:[#allocation2 + $0x8] sm:$0xff] %vm192_vm3, %v195_v33 }
  0x85   : > { %v185_v34 = vpop.permute.xlu1 %184 }
  0x86   : > { %191 = vst.msk [vmem:[#allocation2] sm:$0xfe] %vm190_vm4, %v185_v34 }
  0x87   : > { %v197_v35 = vpop.permute.xlu0 %196 }
  0x88   : > { %201 = vst.msk [vmem:[#allocation2 + $0x20] sm:$0xff] %vm192_vm3, %v197_v35 }
  0x89   : > { %v187_v36 = vpop.permute.xlu1 %186 }
  0x8a   : > { %193 = vst.msk [vmem:[#allocation2 + $0x18] sm:$0xff] %vm192_vm3, %v187_v36 }
  0x8b   : > { %v207_v37 = vpop.permute.xlu0 %206  ;;  %v216_v39 = vld [vmem:[#allocation2 + $0x8] sm:$0xff] }
  0x8c   : > { %212 = vst.msk [vmem:[#allocation2 + $0x10] sm:$0xff] %vm192_vm3, %v207_v37 }
  0x8d   : > { %v209_v38 = vpop.permute.xlu1 %208  ;;  %v215_v42 = vld [vmem:[#allocation2] sm:$0xff] }
  0x8e   : > { %214 = vst.msk [vmem:[#allocation2 + $0x28] sm:$0x7f] %vm213_vm5, %v209_v38 }
  0x8f   : > { %v219_v40 = vld [vmem:[#allocation2 + $0x20] sm:$0xff] }
  0x90   : > { %v222_v41 = vpack.c.bf16 %v219_v40, %v216_v39 }
  0x91   : > { %v218_v43 = vld [vmem:[#allocation2 + $0x18] sm:$0xff] }
  0x92   : > { %455 = vmatprep.mubr.bf16.mxu0 %v222_v41  ;;  %v221_v44 = vpack.c.bf16 %v218_v43, %v215_v42 }
  0x93   : > { %v217_v45 = vld [vmem:[#allocation2 + $0x10] sm:$0xff] }
  0x94   : > { %456 = vmatmul.mubr.bf16.vlgmr.msra.gmra.mrb[0].mxu0 %v221_v44 }
  0x95   : > { %v220_v46 = vld [vmem:[#allocation2 + $0x28] sm:$0xff] }
  0x96   : > { %v223_v47 = vpack.c.bf16 %v220_v46, %v217_v45 }
  0x98   : > { %753 = vmatmul.mubr.bf16.vlgmr.msra.gmra.mrb[0].mxu1 %v223_v47 }
 0x167   : > { %v721_v48 = vpop.f32.mrb[0].mxu0 }
 0x168   : > { %v722_v49 = vpop.f32.mrb[1].mxu0 }
 0x169   : > { %v723_v51 = vadd.f32 %v722_v49, %v721_v48  ;;  %v724_v52 = vpop.f32.mrb[2].mxu0 }
 0x16a   : > { %v725_v53 = vpop.f32.mrb[3].mxu0 }
 0x16b   : > { %v726_v54 = vadd.f32 %v725_v53, %v724_v52  ;;  %v458_v55 = vadd.f32 %v723_v51, %v677_v50  ;;  %v498_v56 = vpop.f32.mrb[0].mxu1 }
 0x16c   : > { %v754_v57 = vpop.f32.mrb[1].mxu1 }
 0x16d   : > { %v499_v58 = vadd.f32 %v498_v56, %v458_v55  ;;  %v461_v59 = vadd.f32 %v726_v54, %v677_v50  ;;  %v501_v60 = vpop.f32.mrb[2].mxu1 }
 0x16e   : > { %v755_v61 = vpop.f32.mrb[3].mxu1 }
 0x16f   : > { %v502_v62 = vadd.f32 %v501_v60, %v461_v59  ;;  %507 = vrot.lane.b32.xlu0 %v499_v58, %s808_s19 }
 0x171   : > { %509 = vrot.lane.b32.xlu1 %v502_v62, %s808_s19 }
 0x173   : > { %518 = vrot.lane.b32.xlu0 %v499_v58, %s809_s20 }
 0x175   : > { %520 = vrot.lane.b32.xlu1 %v502_v62, %s809_s20 }
 0x1e1   : > { %v508_v63 = vpop.permute.xlu0 %507 }
 0x1e2   : > { %v513_v0 = vmax.f32 %v499_v58, %v508_v63 }
 0x1e3   : > { %v510_v1 = vpop.permute.xlu1 %509 }
 0x1e4   : > { %516 = vst.msk [vmem:[#allocation3] sm:$0xff] %vm515_vm6, %v513_v0  ;;  %v514_v2 = vmax.f32 %v502_v62, %v510_v1 }
 0x1e5   : > { %v519_v3 = vpop.permute.xlu0 %518 }
 0x1e6   : > { %517 = vst.msk [vmem:[#allocation3 + $0x8] sm:$0xff] %vm515_vm6, %v514_v2  ;;  %v524_v4 = vmax.f32 %v513_v0, %v519_v3 }
 0x1e7   : > { %v521_v5 = vpop.permute.xlu1 %520 }
 0x1e8   : > { %v525_v6 = vmax.f32 %v514_v2, %v521_v5  ;;  %531 = vrot.lane.b32.xlu0 %v524_v4, %s808_s19  ;;  %527 = vst.msk [vmem:[#allocation3] sm:$0xff] %vm526_vm7, %v524_v4 }
 0x1ea   : > { %533 = vrot.lane.b32.xlu1 %v525_v6, %s808_s19  ;;  %528 = vst.msk [vmem:[#allocation3 + $0x8] sm:$0xff] %vm526_vm7, %v525_v6 }
 0x1ec   : > { %540 = vrot.lane.b32.xlu0 %v524_v4, %s809_s20 }
 0x1ee   : > { %542 = vrot.lane.b32.xlu1 %v525_v6, %s809_s20 }
 0x1f0   : > { %549 = vrot.lane.b32.xlu0 %v524_v4, %s810_s21 }
 0x1f2   : > { %551 = vrot.lane.b32.xlu1 %v525_v6, %s810_s21 }
 0x1f4   : > { %558 = vrot.lane.b32.xlu0 %v524_v4, %s811_s22 }
 0x1f6   : > { %560 = vrot.lane.b32.xlu1 %v525_v6, %s811_s22 }
 0x1f8   : > { %567 = vrot.lane.b32.xlu0 %v524_v4, %s812_s23 }
 0x1fa   : > { %569 = vrot.lane.b32.xlu1 %v525_v6, %s812_s23 }
 0x1fc   : > { %576 = vrot.lane.b32.xlu0 %v524_v4, %s813_s24 }
 0x1fe   : > { %578 = vrot.lane.b32.xlu1 %v525_v6, %s813_s24 }
 0x25a   : > { %v532_v7 = vpop.permute.xlu0 %531 }
 0x25b   : > { %538 = vst.msk [vmem:[#allocation3] sm:$0xff] %vm537_vm8, %v532_v7 }
 0x25c   : > { %v534_v8 = vpop.permute.xlu1 %533 }
 0x25d   : > { %539 = vst.msk [vmem:[#allocation3 + $0x8] sm:$0xff] %vm537_vm8, %v534_v8 }
 0x25e   : > { %v541_v9 = vpop.permute.xlu0 %540 }
 0x25f   : > { %547 = vst.msk [vmem:[#allocation3] sm:$0xff] %vm546_vm9, %v541_v9 }
 0x260   : > { %v543_v10 = vpop.permute.xlu1 %542 }
 0x261   : > { %548 = vst.msk [vmem:[#allocation3 + $0x8] sm:$0xff] %vm546_vm9, %v543_v10 }
 0x262   : > { %v550_v11 = vpop.permute.xlu0 %549 }
 0x263   : > { %556 = vst.msk [vmem:[#allocation3] sm:$0xff] %vm555_vm10, %v550_v11 }
 0x264   : > { %v552_v12 = vpop.permute.xlu1 %551 }
 0x265   : > { %557 = vst.msk [vmem:[#allocation3 + $0x8] sm:$0xff] %vm555_vm10, %v552_v12 }
 0x266   : > { %v559_v13 = vpop.permute.xlu0 %558 }
 0x267   : > { %565 = vst.msk [vmem:[#allocation3] sm:$0xff] %vm564_vm11, %v559_v13 }
 0x268   : > { %v561_v14 = vpop.permute.xlu1 %560 }
 0x269   : > { %566 = vst.msk [vmem:[#allocation3 + $0x8] sm:$0xff] %vm564_vm11, %v561_v14 }
 0x26a   : > { %v568_v15 = vpop.permute.xlu0 %567 }
 0x26b   : > { %574 = vst.msk [vmem:[#allocation3] sm:$0xff] %vm573_vm12, %v568_v15 }
 0x26c   : > { %v570_v16 = vpop.permute.xlu1 %569 }
 0x26d   : > { %575 = vst.msk [vmem:[#allocation3 + $0x8] sm:$0xff] %vm573_vm12, %v570_v16 }
 0x26e   : > { %v577_v17 = vpop.permute.xlu0 %576 }
 0x26f   : > { %583 = vst.msk [vmem:[#allocation3] sm:$0xff] %vm582_vm13, %v577_v17 }
 0x270   : > { %v579_v18 = vpop.permute.xlu1 %578 }
 0x271   : > { %584 = vst.msk [vmem:[#allocation3 + $0x8] sm:$0xff] %vm582_vm13, %v579_v18 }
 0x276   : > { %v585_v19 = vld [vmem:[#allocation3] sm:$0xff] }
 0x277   : > { %v588_v20 = vrot.slane %v585_v19, 1  ;;  %v593_v23 = vrot.slane %v585_v19, 2 }
 0x278   : > { %v586_v21 = vld [vmem:[#allocation3 + $0x8] sm:$0xff] }
 0x279   : > { %v590_v22 = vmax.f32 %v585_v19, %v588_v20  ;;  %v603_v24 = vrot.slane %v586_v21, 1  ;;  %v606_v27 = vrot.slane %v586_v21, 2 }
 0x27b   : > { %592 = vst.msk [vmem:[%s168_s29] sm:$0x1] %vm591_vm14, %v590_v22  ;;  %v595_v25 = vmax.f32 %v590_v22, %v593_v23  ;;  %v605_v26 = vmax.f32 %v585_v19, %v603_v24  ;;  %v611_v28 = vmax.f32 %v586_v21, %v603_v24 }
 0x27d   : > { %597 = vst.msk [vmem:[%s168_s29] sm:$0x2] %vm596_vm15, %v595_v25  ;;  %v608_v29 = vmax.f32 %v605_v26, %v606_v27  ;;  %v612_v30 = vmax.f32 %v611_v28, %v606_v27 }
 0x27e   : > { %599 = vst.msk [vmem:[%s168_s29 - $0x1] sm:$0x8] %vm598_vm0, %v595_v25 }
 0x27f   : > { %601 = vst.msk [vmem:[%s168_s29 - $0x2] sm:$0x20] %vm600_vm1, %v595_v25  ;;  %615 = vst.msk [vmem:[%s168_s29 + $0x2] sm:$0x20] %vm600_vm1, %v612_v30 }
 0x280   : > { %610 = vst.msk [vmem:[%s168_s29 - $0x3] sm:$0x80] %vm609_vm2, %v608_v29 }
 0x281   : > { %613 = vst.msk [vmem:[%s168_s29 + $0x4] sm:$0x2] %vm596_vm15, %v612_v30 }
 0x282   : > { %614 = vst.msk [vmem:[%s168_s29 + $0x3] sm:$0x8] %vm598_vm0, %v612_v30 }
 0x283 PF: > { %s13_s12 = sadd.s32 1, %s803_s12  }
 0x284   : > { %p10_p4 = scmp.ge.s32.totalorder %s13_s12, 4  }
 0x286   :  { %12 = sbr.rel (!%p10_p4) target bundleno = 1 (0x1), region = 62 }

// kernel: tile.33
= control target key start
LH: loop header
LB: loop body
LE: loop exit
PB: predicated region body
PF: predicated region fallthrough
CT: control target
= control target key end

     0   :  { %s22_s0 = inlined_call_operand.vmem [shape: f32[8], index: 0, kind: input, shape index: {}]   ;;  %s23_s1 = inlined_call_operand.vmem [shape: f32[8,8], index: 1, kind: output, shape index: {}]  }
   0x1   :  { %v4_v0 = vld [vmem:[%s22_s0] ss:$0 sm:$0xff] }
   0x2   :  { %5 = vst [vmem:[%s23_s1] sm:$0xff] %v4_v0 }

// kernel: tile.34
= control target key start
LH: loop header
LB: loop body
LE: loop exit
PB: predicated region body
PF: predicated region fallthrough
CT: control target
= control target key end

     0   :  { %s67_s10 = smov 56   ;;  %s68_s11 = smov 40   ;;  %vm3_vm0 = vcmask 64512   ;;  %vm9_vm1 = vcmask 523712   ;;  %vm15_vm2 = vcmask 458112   ;;  %vm21_vm3 = vcmask 392512   ;;  %s111_s0 = inlined_call_operand.vmem [shape: f32[8,8], index: 0, kind: input, shape index: {}]   ;;  %s112_s1 = inlined_call_operand.vmem [shape: f32[1,64], index: 1, kind: output, shape index: {}]  }
   0x1   :  { %v53_v0 = vld [vmem:[%s111_s0 + $0x7] sm:$0x1]   ;;  %v55_v1 = vld [vmem:[%s111_s0 + $0x5] sm:$0x1]   ;;  %v54_v2 = vld [vmem:[%s111_s0 + $0x6] sm:$0x1]  }
   0x2   :  { %7 = vrot.lane.b32.xlu0 %v53_v0, %s67_s10  ;;  %19 = vrot.lane.b32.xlu1 %v55_v1, %s68_s11  ;;  %v56_v3 = vld [vmem:[%s111_s0 + $0x4] sm:$0x1]   ;;  %v2_v4 = vld [vmem:[%s111_s0] sm:$0x1]   ;;  %s69_s18 = smov 48   ;;  %s70_s19 = smov 32  }
   0x3   :  { %4 = vst.msk [vmem:[#allocation0] sm:$0x1] %vm3_vm0, %v2_v4   ;;  %v57_v5 = vld [vmem:[%s111_s0 + $0x3] sm:$0x1]   ;;  %v58_v6 = vld [vmem:[%s111_s0 + $0x2] sm:$0x1]  }
   0x4   :  { %s71_s24 = smov 24   ;;  %s72_s25 = smov 16   ;;  %v59_v7 = vld [vmem:[%s111_s0 + $0x1] sm:$0x1]   ;;  %vm27_vm4 = vcmask 326912   ;;  %vm33_vm5 = vcmask 261312  }
   0x5   :  { %s73_s0 = smov 8   ;;  %vm39_vm6 = vcmask 195712   ;;  %vm45_vm7 = vcmask 130112  }
   0x6   :  { %13 = vrot.lane.b32.xlu0 %v54_v2, %s69_s18  ;;  %25 = vrot.lane.b32.xlu1 %v56_v3, %s70_s19 }
   0xa   :  { %31 = vrot.lane.b32.xlu0 %v57_v5, %s71_s24  ;;  %37 = vrot.lane.b32.xlu1 %v58_v6, %s72_s25 }
   0xe   :  { %43 = vrot.lane.b32.xlu0 %v59_v7, %s73_s0 }
  0x74   :  { %v8_v8 = vpop.permute.xlu0 %7   ;;  %v20_v9 = vpop.permute.xlu1 %19  }
  0x75   :  { %10 = vst.msk [vmem:[#allocation0] sm:$0x1] %vm9_vm1, %v8_v8  }
  0x78   :  { %v14_v10 = vpop.permute.xlu0 %13   ;;  %v26_v11 = vpop.permute.xlu1 %25  }
  0x79   :  { %16 = vst.msk [vmem:[#allocation0] sm:$0x1] %vm15_vm2, %v14_v10  }
  0x7a   :  { %22 = vst.msk [vmem:[#allocation0] sm:$0x1] %vm21_vm3, %v20_v9  }
  0x7b   :  { %28 = vst.msk [vmem:[#allocation0] sm:$0x1] %vm27_vm4, %v26_v11  }
  0x7c   :  { %v32_v12 = vpop.permute.xlu0 %31   ;;  %v38_v13 = vpop.permute.xlu1 %37  }
  0x7d   :  { %34 = vst.msk [vmem:[#allocation0] sm:$0x1] %vm33_vm5, %v32_v12  }
  0x7e   :  { %40 = vst.msk [vmem:[#allocation0] sm:$0x1] %vm39_vm6, %v38_v13  }
  0x80   :  { %v44_v14 = vpop.permute.xlu0 %43  }
  0x81   :  { %46 = vst.msk [vmem:[#allocation0] sm:$0x1] %vm45_vm7, %v44_v14  }
  0x88   :  { %v50_v15 = vld [vmem:[#allocation0] sm:$0x1] }
  0x89   :  { %52 = vst [vmem:[%s112_s1] sm:$0x1] %v50_v15 }

// kernel: cnn_down_stack_forward.4
= control target key start
LH: loop header
LB: loop body
LE: loop exit
PB: predicated region body
PF: predicated region fallthrough
CT: control target
= control target key end

     0   :  { %s1147_s18 = smov 0   ;;  %s1360_s0 = inlined_call_operand.vmem [shape: f32[2,8,64], index: 0, kind: input, shape index: {}]   ;;  %s1361_s1 = inlined_call_operand.vmem [shape: bf16[384,64], index: 1, kind: input, shape index: {}]   ;;  %s1362_s2 = inlined_call_operand.vmem [shape: f32[1,64], index: 2, kind: input, shape index: {}]   ;;  %s1363_s3 = inlined_call_operand.vmem [shape: bf16[384,64], index: 3, kind: input, shape index: {}]   ;;  %s1364_s4 = inlined_call_operand.vmem [shape: f32[1,64], index: 4, kind: input, shape index: {}]   ;;  %s1365_s5 = inlined_call_operand.vmem [shape: f32[2,8,64], index: 5, kind: output, shape index: {}]  }
   0x1 LB: > { %s886_s19 = sadd.s32 4294967295, %s1112_s18   ;;  %p890_p0 = scmp.ge.s32.totalorder %s1112_s18, 1  ;;  %s1112_s18 = sphi %s1147_s18, %s15_s18  }
   0x2   : > { %p186_p1 = scmp.lt.s32.totalorder %s1112_s18, 3 }
   0x4   : > { %p187_p2 = pnand %p890_p0, %p186_p1 }
   0x5   : > { %p212_p3 = scmp.lt.s32.totalorder (!%p187_p2), %s886_s19, 1  ;;  %v1058_v0 = vld [vmem:[%s1361_s1 + $0x40] sm:$0xff] (!%p187_p2)   ;;  %v1114_v2 = vmov (!%p187_p2), 0.0   ;;  %v1061_v4 = vld [vmem:[%s1361_s1 + $0x48] sm:$0xff] (!%p187_p2)   ;;  %v1064_v9 = vld [vmem:[%s1361_s1 + $0x50] sm:$0xff] (!%p187_p2)   ;;  %s1115_s15 = smov (!%p187_p2), 8  }
   0x6   : > { %190 = sbr.rel (%p187_p2) target bundleno = 718 (0x2ce), region = 40  ;;  %v1059_v1 = vld [vmem:[%s1361_s1] sm:$0xff] (!%p187_p2)   ;;  %1007 = vmatprep.subr.bf16.mxu1 (!%p187_p2), %v1114_v2  ;;  %222 = vst [vmem:[#allocation2] sm:$0xff] (!%p187_p2), %v1114_v2  ;;  %223 = vst [vmem:[#allocation2 + $0x8] sm:$0xff] (!%p187_p2), %v1114_v2  ;;  %945 = vmatprep.subr.bf16.mxu0 (!%p187_p2), %v1058_v0  ;;  %v1062_v5 = vld [vmem:[%s1361_s1 + $0x8] sm:$0xff] (!%p187_p2)   ;;  %vm1116_vm0 = vmmov (!%p187_p2), 0  }
   0x7   : > { %224 = vst [vmem:[#allocation2 + $0x10] sm:$0xff] (!%p187_p2), %v1114_v2  ;;  %v1060_v3 = vld [vmem:[%s1361_s1 + $0x80] sm:$0xff] (!%p187_p2)   ;;  %946 = vmatpush3.bf16.msra.mxu0 (!%p187_p2), %v1059_v1  ;;  %v1063_v7 = vld [vmem:[%s1361_s1 + $0x88] sm:$0xff] (!%p187_p2)   ;;  %v1065_v10 = vld [vmem:[%s1361_s1 + $0x10] sm:$0xff] (!%p187_p2)   ;;  %1023 = vmatprep.mubr.msk.bf16.mxu1 (!%p187_p2), %vm1116_vm0, %v1114_v2  ;;  %vm236_vm1 = vcmask (!%p187_p2), 588864   ;;  %vm242_vm2 = vcmask (!%p187_p2), 587840  }
   0x8   : > { %1008 = vmatpush3.bf16.msra.mxu1 (!%p187_p2), %v1060_v3  ;;  %947 = vmatprep.subr.bf16.mxu0 (!%p187_p2), %v1061_v4  ;;  %v1066_v13 = vld [vmem:[%s1361_s1 + $0x90] sm:$0xff] (!%p187_p2)   ;;  %v1067_v14 = vld [vmem:[%s1361_s1 + $0x58] sm:$0xff] (!%p187_p2)   ;;  %v1070_v17 = vld [vmem:[%s1361_s1 + $0x60] sm:$0xff] (!%p187_p2)   ;;  %vm231_vm3 = vcmask (!%p187_p2), 588865   ;;  %vm831_vm4 = vcmask (!%p187_p2), 523264  }
   0x9   : > { %1009 = vmatprep.subr.bf16.mxu1 (!%p187_p2), %v1114_v2  ;;  %v1068_v15 = vld [vmem:[%s1361_s1 + $0x18] sm:$0xff] (!%p187_p2)   ;;  %v1071_v18 = vld [vmem:[%s1361_s1 + $0x20] sm:$0xff] (!%p187_p2)   ;;  %v1073_v20 = vld [vmem:[%s1361_s1 + $0x68] sm:$0xff] (!%p187_p2)  }
   0xa   : > { %v1069_v16 = vld [vmem:[%s1361_s1 + $0x98] sm:$0xff] (!%p187_p2)   ;;  %v1072_v19 = vld [vmem:[%s1361_s1 + $0xa0] sm:$0xff] (!%p187_p2)   ;;  %v1074_v21 = vld [vmem:[%s1361_s1 + $0x28] sm:$0xff] (!%p187_p2)  }
   0xb   : > { %948 = vmatpush3.bf16.msra.mxu0 (!%p187_p2), %v1062_v5  ;;  %v1075_v22 = vld [vmem:[%s1361_s1 + $0xa8] sm:$0xff] (!%p187_p2)   ;;  %v1076_v23 = vld [vmem:[%s1361_s1 + $0x70] sm:$0xff] (!%p187_p2)   ;;  %v1079_v26 = vld [vmem:[%s1361_s1 + $0x78] sm:$0xff] (!%p187_p2)  }
   0xc   : > { %1010 = vmatpush3.bf16.msra.mxu1 (!%p187_p2), %v1063_v7  ;;  %949 = vmatprep.subr.bf16.mxu0 (!%p187_p2), %v1064_v9  ;;  %v1077_v24 = vld [vmem:[%s1361_s1 + $0x30] sm:$0xff] (!%p187_p2)   ;;  %v1080_v27 = vld [vmem:[%s1361_s1 + $0x38] sm:$0xff] (!%p187_p2)   ;;  %v1082_v38 = vld [vmem:[%s1363_s3 + $0x40] sm:$0xff] (!%p187_p2)  }
   0xd   : > { %s1367_s19 = smov (!%p212_p3, %s886_s19), 1  ;;  %1011 = vmatprep.subr.bf16.mxu1 %v1114_v2  ;;  %v1078_v25 = vld [vmem:[%s1361_s1 + $0xb0] sm:$0xff]   ;;  %v1081_v28 = vld [vmem:[%s1361_s1 + $0xb8] sm:$0xff]   ;;  %v1083_v39 = vld [vmem:[%s1363_s3] sm:$0xff]  }
   0xe   : > { %s891_s26 = sshll.u32 %s1367_s19, 3  ;;  %v1084_v40 = vld [vmem:[%s1363_s3 + $0x80] sm:$0xff]   ;;  %v1085_v41 = vld [vmem:[%s1363_s3 + $0x48] sm:$0xff]   ;;  %v1088_v44 = vld [vmem:[%s1363_s3 + $0x50] sm:$0xff]  }
   0xf   : > { %s215_s6 = scalar_lea.vmem %s1360_s0, %s891_s26  ;;  %950 = vmatpush3.bf16.msra.mxu0 %v1065_v10  ;;  %v1087_v42 = vld [vmem:[%s1363_s3 + $0x88] sm:$0xff]   ;;  %v1090_v45 = vld [vmem:[%s1363_s3 + $0x90] sm:$0xff]   ;;  %v1091_v47 = vld [vmem:[%s1363_s3 + $0x58] sm:$0xff]   ;;  %s219_s17 = scalar_lea.vmem %s1365_s5, %s891_s26 }
  0x10   : > { %v1182_v6 = vld [vmem:[%s215_s6] sm:$0xff]  ;;  %1012 = vmatpush3.bf16.msra.mxu1 %v1066_v13  ;;  %951 = vmatprep.subr.bf16.mxu0 %v1067_v14  ;;  %v1086_v43 = vld [vmem:[%s1363_s3 + $0x8] sm:$0xff]   ;;  %v1089_v46 = vld [vmem:[%s1363_s3 + $0x10] sm:$0xff]  }
  0x11   : > { %v225_v8 = vmax.f32 %v1182_v6, 0.0  ;;  %1013 = vmatprep.subr.bf16.mxu1 %v1114_v2  ;;  %v1093_v48 = vld [vmem:[%s1363_s3 + $0x98] sm:$0xff]   ;;  %v1094_v50 = vld [vmem:[%s1363_s3 + $0x60] sm:$0xff]   ;;  %v1097_v53 = vld [vmem:[%s1363_s3 + $0x68] sm:$0xff]  }
  0x12   : > { %v1092_v49 = vld [vmem:[%s1363_s3 + $0x18] sm:$0xff]   ;;  %v1096_v51 = vld [vmem:[%s1363_s3 + $0xa0] sm:$0xff]   ;;  %v1098_v54 = vld [vmem:[%s1363_s3 + $0x28] sm:$0xff]  }
  0x13   : > { %233 = vrot.lane.b32.xlu0 %v225_v8, %s1115_s15  ;;  %v227_v11 = vrot.slane %v225_v8, 7  ;;  %v238_v12 = vrot.slane %v225_v8, 1  ;;  %952 = vmatpush3.bf16.msra.mxu0 %v1068_v15  ;;  %v1095_v52 = vld [vmem:[%s1363_s3 + $0x20] sm:$0xff]   ;;  %v1099_v56 = vld [vmem:[%s1363_s3 + $0xa8] sm:$0xff]   ;;  %v1100_v58 = vld [vmem:[%s1363_s3 + $0x70] sm:$0xff]  }
  0x14   : > { %1014 = vmatpush3.bf16.msra.mxu1 %v1069_v16  ;;  %953 = vmatprep.subr.bf16.mxu0 %v1070_v17  ;;  %v1101_v61 = vld [vmem:[%s1363_s3 + $0x30] sm:$0xff]   ;;  %v893_v63 = vld [vmem:[%s1362_s2] ss:$0 sm:$0xff]  ;;  %v1103_v3 = vld [vmem:[%s1363_s3 + $0x78] sm:$0xff]  }
  0x15   : > { %239 = vrot.lane.b32.xlu1 %v238_v12, %s1115_s15  ;;  %1015 = vmatprep.subr.bf16.mxu1 %v1114_v2  ;;  %v1102_v1 = vld [vmem:[%s1363_s3 + $0xb0] sm:$0xff]   ;;  %v1104_v7 = vld [vmem:[%s1363_s3 + $0x38] sm:$0xff]  }
  0x17   : > { %228 = vrot.lane.b32.xlu0 %v227_v11, %s1115_s15  ;;  %954 = vmatpush3.bf16.msra.mxu0 %v1071_v18  ;;  %v1105_v11 = vld [vmem:[%s1363_s3 + $0xb8] sm:$0xff]  }
  0x18   : > { %1016 = vmatpush3.bf16.msra.mxu1 %v1072_v19  ;;  %955 = vmatprep.subr.bf16.mxu0 %v1073_v20 }
  0x19   : > { %1017 = vmatprep.subr.bf16.mxu1 %v1114_v2 }
  0x1b   : > { %956 = vmatpush3.bf16.msra.mxu0 %v1074_v21 }
  0x1c   : > { %1018 = vmatpush3.bf16.msra.mxu1 %v1075_v22  ;;  %957 = vmatprep.subr.bf16.mxu0 %v1076_v23 }
  0x1d   : > { %1019 = vmatprep.subr.bf16.mxu1 %v1114_v2 }
  0x1f   : > { %958 = vmatpush3.bf16.msra.mxu0 %v1077_v24 }
  0x20   : > { %1020 = vmatpush3.bf16.msra.mxu1 %v1078_v25  ;;  %959 = vmatprep.subr.bf16.mxu0 %v1079_v26  ;;  %v918_v25 = vld [vmem:[%s1364_s4] ss:$0 sm:$0xff] }
  0x21   : > { %1021 = vmatprep.subr.bf16.mxu1 %v1114_v2 }
  0x23   : > { %960 = vmatpush3.bf16.msra.mxu0 %v1080_v27 }
  0x24   : > { %1022 = vmatpush3.bf16.msra.mxu1 %v1081_v28  ;;  %976 = vmatprep.subr.bf16.mxu0 %v1082_v38 }
  0x25   : > { %1027 = vmatprep.subr.bf16.mxu1 %v1114_v2 }
  0x85   : > { %v234_v29 = vpop.permute.xlu0 %233 }
  0x86   : > { %237 = vst.msk [vmem:[#allocation2 + $0x8] sm:$0xff] %vm236_vm1, %v234_v29 }
  0x87   : > { %v240_v30 = vpop.permute.xlu1 %239 }
  0x88   : > { %243 = vst.msk [vmem:[#allocation2 + $0x10] sm:$0x7f] %vm242_vm2, %v240_v30 }
  0x89   : > { %v229_v31 = vpop.permute.xlu0 %228 }
  0x8a   : > { %232 = vst.msk [vmem:[#allocation2] sm:$0xfe] %vm231_vm3, %v229_v31 }
  0x8d   : > { %v245_v32 = vld [vmem:[#allocation2 + $0x8] sm:$0xff] }
  0x8e   : > { %v248_v33 = vpack.c.bf16 %v245_v32, %v245_v32 }
  0x8f   : > { %v246_v34 = vld [vmem:[#allocation2 + $0x10] sm:$0xff] }
  0x90   : > { %481 = vmatprep.mubr.bf16.mxu0 %v248_v33  ;;  %v249_v35 = vpack.c.bf16 %v246_v34, %v246_v34 }
  0x91   : > { %v244_v36 = vld [vmem:[#allocation2] sm:$0xff] }
  0x92   : > { %v247_v37 = vpack.c.bf16 %v244_v36, %v244_v36  ;;  %1024 = vmatmul.mubr.bf16.vlgmr.msra.gmra.mrb[0].mxu1 %v249_v35 }
  0x93   : > { %1043 = vmatprep.mubr.msk.bf16.mxu1 %vm1116_vm0, %v1114_v2  ;;  %1028 = vmatpush3.bf16.msra.mxu1 %v1084_v40 }
  0x94   : > { %482 = vmatmul.mubr.bf16.vlgmr.msra.gmra.mrb[0].mxu0 %v247_v37  ;;  %1029 = vmatprep.subr.bf16.mxu1 %v1114_v2 }
  0x95   : > { %977 = vmatpush3.bf16.msra.mxu0 %v1083_v39 }
  0x96   : > { %978 = vmatprep.subr.bf16.mxu0 %v1085_v41 }
  0x97   : > { %1030 = vmatpush3.bf16.msra.mxu1 %v1087_v42 }
  0x98   : > { %1031 = vmatprep.subr.bf16.mxu1 %v1114_v2 }
  0x99   : > { %979 = vmatpush3.bf16.msra.mxu0 %v1086_v43 }
  0x9a   : > { %980 = vmatprep.subr.bf16.mxu0 %v1088_v44 }
  0x9b   : > { %1032 = vmatpush3.bf16.msra.mxu1 %v1090_v45 }
  0x9c   : > { %1033 = vmatprep.subr.bf16.mxu1 %v1114_v2 }
  0x9d   : > { %981 = vmatpush3.bf16.msra.mxu0 %v1089_v46 }
  0x9e   : > { %982 = vmatprep.subr.bf16.mxu0 %v1091_v47 }
  0x9f   : > { %1034 = vmatpush3.bf16.msra.mxu1 %v1093_v48 }
  0xa0   : > { %1035 = vmatprep.subr.bf16.mxu1 %v1114_v2 }
  0xa1   : > { %983 = vmatpush3.bf16.msra.mxu0 %v1092_v49 }
  0xa2   : > { %984 = vmatprep.subr.bf16.mxu0 %v1094_v50 }
  0xa3   : > { %1036 = vmatpush3.bf16.msra.mxu1 %v1096_v51 }
  0xa4   : > { %1037 = vmatprep.subr.bf16.mxu1 %v1114_v2 }
  0xa5   : > { %985 = vmatpush3.bf16.msra.mxu0 %v1095_v52 }
  0xa6   : > { %986 = vmatprep.subr.bf16.mxu0 %v1097_v53 }
  0xa7   : > { %1038 = vmatpush3.bf16.msra.mxu1 %v1099_v56 }
  0xa8   : > { %1039 = vmatprep.subr.bf16.mxu1 %v1114_v2 }
  0xa9   : > { %987 = vmatpush3.bf16.msra.mxu0 %v1098_v54 }
  0xaa   : > { %988 = vmatprep.subr.bf16.mxu0 %v1100_v58 }
  0xab   : > { %1040 = vmatpush3.bf16.msra.mxu1 %v1102_v1 }
  0xac   : > { %1041 = vmatprep.subr.bf16.mxu1 %v1114_v2 }
  0xad   : > { %989 = vmatpush3.bf16.msra.mxu0 %v1101_v61 }
  0xae   : > { %990 = vmatprep.subr.bf16.mxu0 %v1103_v3 }
  0xaf   : > { %1042 = vmatpush3.bf16.msra.mxu1 %v1105_v11 }
  0xb1   : > { %991 = vmatpush3.bf16.msra.mxu0 %v1104_v7 }
 0x165   : > { %v523_v55 = vpop.f32.mrb[0].mxu1 }
 0x166   : > { %v1025_v57 = vpop.f32.mrb[1].mxu1 }
 0x167   : > { %v961_v59 = vpop.f32.mrb[0].mxu0  ;;  %v526_v60 = vpop.f32.mrb[2].mxu1 }
 0x168   : > { %v962_v62 = vpop.f32.mrb[1].mxu0  ;;  %v1026_v0 = vpop.f32.mrb[3].mxu1 }
 0x169   : > { %v963_v4 = vadd.f32 %v962_v62, %v961_v59  ;;  %v964_v5 = vpop.f32.mrb[2].mxu0 }
 0x16a   : > { %v965_v8 = vpop.f32.mrb[3].mxu0 }
 0x16b   : > { %v484_v9 = vadd.f32 %v963_v4, %v893_v63 }
 0x16d   : > { %v524_v10 = vadd.f32 %v523_v55, %v484_v9 }
 0x16f   : > { %v529_v12 = vmax.f32 %v524_v10, 0.0 }
 0x171   : > { %536 = vrot.lane.b32.xlu1 %v529_v12, %s1115_s15  ;;  %v531_v13 = vrot.slane %v529_v12, 7  ;;  %v540_v14 = vrot.slane %v529_v12, 1 }
 0x173   : > { %532 = vrot.lane.b32.xlu0 %v531_v13, %s1115_s15 }
 0x175   : > { %541 = vrot.lane.b32.xlu1 %v540_v14, %s1115_s15 }
 0x1e3   : > { %v537_v15 = vpop.permute.xlu1 %536 }
 0x1e4   : > { %539 = vst.msk [vmem:[#allocation2 + $0x8] sm:$0xff] %vm236_vm1, %v537_v15 }
 0x1e5   : > { %v533_v2 = vpop.permute.xlu0 %532 }
 0x1e6   : > { %535 = vst.msk [vmem:[#allocation2] sm:$0xfe] %vm231_vm3, %v533_v2 }
 0x1e7   : > { %v542_v16 = vpop.permute.xlu1 %541 }
 0x1e8   : > { %544 = vst.msk [vmem:[#allocation2 + $0x10] sm:$0x7f] %vm242_vm2, %v542_v16 }
 0x1eb   : > { %v546_v17 = vld [vmem:[#allocation2 + $0x8] sm:$0xff] }
 0x1ec   : > { %v549_v18 = vpack.c.bf16 %v546_v17, %v546_v17 }
 0x1ed   : > { %v545_v19 = vld [vmem:[#allocation2] sm:$0xff] }
 0x1ee   : > { %782 = vmatprep.mubr.bf16.mxu0 %v549_v18  ;;  %v548_v20 = vpack.c.bf16 %v545_v19, %v545_v19 }
 0x1ef   : > { %v547_v21 = vld [vmem:[#allocation2 + $0x10] sm:$0xff] }
 0x1f0   : > { %783 = vmatmul.mubr.bf16.vlgmr.msra.gmra.mrb[4].mxu0 %v548_v20  ;;  %v550_v22 = vpack.c.bf16 %v547_v21, %v547_v21 }
 0x1f2   : > { %1044 = vmatmul.mubr.bf16.vlgmr.msra.gmra.mrb[4].mxu1 %v550_v22 }
 0x2c3   : > { %v992_v23 = vpop.f32.mrb[4].mxu0 }
 0x2c4   : > { %v993_v24 = vpop.f32.mrb[5].mxu0 }
 0x2c5   : > { %v994_v26 = vadd.f32 %v993_v24, %v992_v23  ;;  %v995_v27 = vpop.f32.mrb[6].mxu0  ;;  %v824_v28 = vpop.f32.mrb[4].mxu1 }
 0x2c6   : > { %v996_v29 = vpop.f32.mrb[7].mxu0  ;;  %v1045_v30 = vpop.f32.mrb[5].mxu1 }
 0x2c7   : > { %v785_v31 = vadd.f32 %v994_v26, %v918_v25  ;;  %v827_v32 = vpop.f32.mrb[6].mxu1 }
 0x2c8   : > { %v1046_v33 = vpop.f32.mrb[7].mxu1 }
 0x2c9   : > { %v825_v34 = vadd.f32 %v824_v28, %v785_v31 }
 0x2cb   : > { %v830_v35 = vadd.f32 %v825_v34, %v1182_v6 }
 0x2cd   : > { %832 = vst.msk [vmem:[%s219_s17] sm:$0xff] %vm831_vm4, %v830_v35 }
 0x2ce PF: > { %s15_s18 = sadd.s32 1, %s1112_s18  }
 0x2cf   : > { %p12_p4 = scmp.ge.s32.totalorder %s15_s18, 4  }
 0x2d1   :  { %14 = sbr.rel (!%p12_p4) target bundleno = 1 (0x1), region = 70 }

</bundles_post_ra>
